<compile_context>
chip_gen: v7x
topology: tpu7x:2x2x1
jax: 0.10.0
libtpu: 0.0.40
codegen_flags: <defaults>
</compile_context>

<pallas_src>
import functools

import jax
import jax.numpy as jnp
from jax.experimental import pallas as pl
from jax.experimental.pallas import tpu as pltpu


# ----------------------------------------------------------------------------
# Small host-side helpers
# ----------------------------------------------------------------------------
def _round_up(x, m):
    return -(-x // m) * m


def _device_kind():
    try:
        return jax.devices()[0].device_kind.lower()
    except Exception:
        return ""


def _vmem_capacity_bytes():
    try:
        return int(pltpu.get_tpu_info().vmem_capacity_bytes)
    except Exception:
        kind = _device_kind()
        return (64 << 20) if ("v7" in kind or "7x" in kind) else (128 << 20)


def _tile_padded_bytes(shape, dtype):
    """Approximate VMEM footprint after (sublane, lane) tile padding."""
    itemsize = jnp.dtype(dtype).itemsize
    dims = list(shape)
    if len(dims) >= 1:
        dims[-1] = _round_up(dims[-1], 128)
    if len(dims) >= 2:
        sub = 8 * max(1, 4 // itemsize)          # 8 for f32, 16 for bf16
        dims[-2] = _round_up(dims[-2], sub)
    n = 1
    for d in dims:
        n *= int(d)
    return n * itemsize


# ----------------------------------------------------------------------------
# Fused DoubleConv Pallas kernel
# ----------------------------------------------------------------------------
def _double_conv_kernel(x_ref, w1_ref, b1_ref, w2_ref, b2_ref, out_ref,
                        xcat_ref, mcat_ref, *,
                        H, W, Cin, Cmid, Ct, w2_resident):
    # Blocks:
    #   x_ref   : (1, H, W, Cin)              bf16   one batch element
    #   w1_ref  : (3, 3*Cin, Cmid)            bf16   tap-fused conv1 weights
    #   b1_ref  : (1, Cmid)                   f32
    #   w2_ref  : (3, 3*Cmid, Ct or Cout_p)   bf16   tap-fused conv2 weights
    #   b2_ref  : (1, Ct)                     f32
    #   out_ref : (1, H, W, Ct)               f32 (or bf16) one Cout tile
    # Scratch (persists across the inner Cout-tile grid axis):
    #   xcat_ref: (H+2, W, 3*Cin)             bf16   kx-concatenated padded x
    #   mcat_ref: (H+2, W, 3*Cmid)            bf16   kx-concatenated conv1 out
    co = pl.program_id(1)
    HW = H * W
    K1 = 3 * Cin
    K2 = 3 * Cmid

    # ---- conv1 + ReLU: compute once per batch element (first Cout tile) ----
    @pl.when(co == 0)
    def _():
        x = x_ref[0]                                          # (H, W, Cin)
        zc = jnp.zeros((H, 1, Cin), x.dtype)
        # xcat[y, c, kx*Cin:(kx+1)*Cin] == zero-padded-x[y-1, c+kx-1, :]
        xcat = jnp.concatenate(
            [jnp.concatenate([zc, x[:, :W - 1, :]], axis=1),  # kx = 0
             x,                                               # kx = 1
             jnp.concatenate([x[:, 1:, :], zc], axis=1)],     # kx = 2
            axis=-1)                                          # (H, W, 3*Cin)
        zr = jnp.zeros((1, W, K1), x.dtype)
        xcat_ref[...] = jnp.concatenate([zr, xcat, zr], axis=0)

        # Bias-initialized f32 accumulator; 3 wide-K matmuls (one per ky).
        acc = jnp.broadcast_to(b1_ref[...], (HW, Cmid)).astype(jnp.float32)
        for ky in range(3):
            patch = xcat_ref[pl.ds(ky, H)].reshape(HW, K1)    # aligned load
            acc = acc + jnp.dot(patch, w1_ref[ky],
                                preferred_element_type=jnp.float32)
        m = jnp.maximum(acc, 0.0).astype(mcat_ref.dtype).reshape(H, W, Cmid)

        # Same kx-concatenated + row-haloed layout for the intermediate.
        zc2 = jnp.zeros((H, 1, Cmid), m.dtype)
        mcat = jnp.concatenate(
            [jnp.concatenate([zc2, m[:, :W - 1, :]], axis=1),
             m,
             jnp.concatenate([m[:, 1:, :], zc2], axis=1)],
            axis=-1)                                          # (H, W, 3*Cmid)
        zr2 = jnp.zeros((1, W, K2), m.dtype)
        mcat_ref[...] = jnp.concatenate([zr2, mcat, zr2], axis=0)

    # ---- conv2 + ReLU for this Cout tile (reads VMEM-resident mcat) --------
    co_off = pl.multiple_of(co * Ct, 128) if w2_resident else 0
    acc2 = jnp.broadcast_to(b2_ref[...], (HW, Ct)).astype(jnp.float32)
    for ky in range(3):
        patch = mcat_ref[pl.ds(ky, H)].reshape(HW, K2)        # aligned load
        wk = (w2_ref[ky, :, pl.ds(co_off, Ct)] if w2_resident
              else w2_ref[ky])
        acc2 = acc2 + jnp.dot(patch, wk, preferred_element_type=jnp.float32)
    acc2 = jnp.maximum(acc2, 0.0)
    # TODO(synk): once a spatial row-group grid axis is added for real H/W,
    # accumulate per row group to bound acc/acc2 live ranges (vreg spills).
    out_ref[0] = acc2.reshape(H, W, Ct).astype(out_ref.dtype)


def double_conv_pallas(x_nhwc, w1, b1, w2, b2, *, out_dtype=jnp.float32):
    """Fused (conv3x3 + ReLU) x2, stride 1, 'same' padding.

    x: (N, H, W, Cin) f32; w1: (3,3,Cin,Cmid); w2: (3,3,Cmid,Cout); b*: (C,).
    Returns (N, H, W, Cout) in out_dtype (f32 by default; pass bf16 to halve
    output HBM writeback when the consumer accepts it).
    """
    N, H, W, Cin = x_nhwc.shape
    Cmid = w1.shape[-1]
    Cout = w2.shape[-1]

    # Lane-dense output channels (padded, sliced back below).
    Cout_p = _round_up(Cout, 128)
    kind = _device_kind()
    small_mxu = any(v in kind for v in ("v2", "v3", "v4", "v5"))
    Ct = 256 if (Cout_p % 256 == 0 and not small_mxu) else 128
    n_co = Cout_p // Ct

    # bf16 activations / weights (MXU-native); f32 accumulation inside.
    xb = x_nhwc.astype(jnp.bfloat16)
    w1r = w1.astype(jnp.bfloat16).reshape(3, 3 * Cin, Cmid)
    b1r = b1.reshape(1, Cmid).astype(jnp.float32)
    w2p = jnp.pad(w2, ((0, 0), (0, 0), (0, 0), (0, Cout_p - Cout)))
    w2r = w2p.astype(jnp.bfloat16).reshape(3, 3 * Cmid, Cout_p)
    b2r = jnp.pad(b2, (0, Cout_p - Cout)).reshape(1, Cout_p).astype(jnp.float32)

    # Generation-aware VMEM budget (~48 MiB on v7x, ~96 MiB on v5e/v6e).
    vmem_budget = int(_vmem_capacity_bytes() * 3 // 4)

    # Keep the whole (tap-fused) w2 VMEM-resident when it fits comfortably and
    # there is more than one Cout tile (otherwise its block index is already
    # constant and it never gets re-fetched).
    w2_full_bytes = _tile_padded_bytes((3, 3 * Cmid, Cout_p), jnp.bfloat16)
    w2_resident = (n_co > 1) and (w2_full_bytes <= vmem_budget // 8)

    if w2_resident:
        w2_spec = pl.BlockSpec((3, 3 * Cmid, Cout_p), lambda n, co: (0, 0, 0))
        w2_blk = (3, 3 * Cmid, Cout_p)
    else:
        w2_spec = pl.BlockSpec((3, 3 * Cmid, Ct), lambda n, co: (0, 0, co))
        w2_blk = (3, 3 * Cmid, Ct)

    blocks = [
        ((1, H, W, Cin), jnp.bfloat16),
        ((3, 3 * Cin, Cmid), jnp.bfloat16),
        ((1, Cmid), jnp.float32),
        (w2_blk, jnp.bfloat16),
        ((1, Ct), jnp.float32),
        ((1, H, W, Ct), out_dtype),
    ]
    scratch = [
        ((H + 2, W, 3 * Cin), jnp.bfloat16),
        ((H + 2, W, 3 * Cmid), jnp.bfloat16),
    ]
    bytes_needed = (2 * sum(_tile_padded_bytes(s, d) for s, d in blocks)
                    + sum(_tile_padded_bytes(s, d) for s, d in scratch))
    vmem_limit = int(min(vmem_budget, max(32 << 20, 2 * bytes_needed)))

    kernel = functools.partial(_double_conv_kernel, H=H, W=W, Cin=Cin,
                               Cmid=Cmid, Ct=Ct, w2_resident=w2_resident)

    # TODO(synk): at real resolutions add a spatial row-group grid axis (with a
    # 1-row halo) so the (1,H,W,C) blocks, the (H+2,W,3*C) scratch and the
    # (H*W,C) accumulators stay within v7x's 64 MiB VMEM and the vreg file.
    out_p = pl.pallas_call(
        kernel,
        out_shape=jax.ShapeDtypeStruct((N, H, W, Cout_p), out_dtype),
        grid_spec=pltpu.PrefetchScalarGridSpec(
            num_scalar_prefetch=0,
            grid=(N, n_co),
            in_specs=[
                pl.BlockSpec((1, H, W, Cin), lambda n, co: (n, 0, 0, 0)),
                pl.BlockSpec((3, 3 * Cin, Cmid), lambda n, co: (0, 0, 0)),
                pl.BlockSpec((1, Cmid), lambda n, co: (0, 0)),
                w2_spec,
                pl.BlockSpec((1, Ct), lambda n, co: (0, co)),
            ],
            out_specs=pl.BlockSpec((1, H, W, Ct), lambda n, co: (n, 0, 0, co)),
            scratch_shapes=[
                pltpu.VMEM((H + 2, W, 3 * Cin), jnp.bfloat16),
                pltpu.VMEM((H + 2, W, 3 * Cmid), jnp.bfloat16),
            ],
        ),
        compiler_params=pltpu.CompilerParams(
            # Batch axis parallel (megacore). The Cout-tile axis MUST stay the
            # innermost, sequential ("arbitrary") axis: conv1's intermediate
            # (mcat scratch) is written at co == 0 and reused for co > 0.
            dimension_semantics=("parallel", "arbitrary"),
            vmem_limit_bytes=vmem_limit),
    )(xb, w1r, b1r, w2r, b2r)
    return out_p[..., :Cout]


# ----------------------------------------------------------------------------
# Public forward (NCHW in / NCHW out, matching the PyTorch module)
# ----------------------------------------------------------------------------
def double_conv_forward(x_nchw, params):
    (w1, b1), (w2, b2) = params
    x = jnp.transpose(x_nchw, (0, 2, 3, 1))          # NCHW -> NHWC
    y = double_conv_pallas(x, w1, b1, w2, b2)
    return jnp.transpose(y, (0, 3, 1, 2))            # NHWC -> NCHW


def double_conv_reference(x_nchw, params):
    """Pure-JAX/XLA f32 reference (matches the PyTorch forward)."""
    (w1, b1), (w2, b2) = params
    x = jnp.transpose(x_nchw, (0, 2, 3, 1))
    dn = ('NHWC', 'HWIO', 'NHWC')
    y = jax.lax.conv_general_dilated(x, w1, (1, 1), 'SAME',
                                     dimension_numbers=dn)
    y = jnp.maximum(y + b1, 0.0)
    y = jax.lax.conv_general_dilated(y, w2, (1, 1), 'SAME',
                                     dimension_numbers=dn)
    y = jnp.maximum(y + b2, 0.0)
    return jnp.transpose(y, (0, 3, 1, 2))


# ----------------------------------------------------------------------------
# Deterministic parameter init (shapes follow nn.Conv2d(cin, cout, 3, padding=1))
# ----------------------------------------------------------------------------
def init_conv(key, K, cin, cout):
    kw, kb = jax.random.split(key)
    fan_in = K * K * cin
    w = jax.random.normal(kw, (K, K, cin, cout), jnp.float32) * (2.0 / fan_in) ** 0.5
    b = jax.random.normal(kb, (cout,), jnp.float32) * 0.01
    return w, b


def init_double_conv(key, cin, cout):
    k1, k2 = jax.random.split(key)
    return (init_conv(k1, 3, cin, cout), init_conv(k2, 3, cout, cout))


# ----------------------------------------------------------------------------
if __name__ == "__main__":
    in_channels, out_channels = 4, 64
    N, H, W = 2, 16, 16

    key = jax.random.PRNGKey(0)
    k_x, k_p = jax.random.split(key)
    x = jax.random.normal(k_x, (N, in_channels, H, W), jnp.float32)
    params = init_double_conv(k_p, in_channels, out_channels)

    fwd = jax.jit(double_conv_forward)
    y = jax.block_until_ready(fwd(x, params))

    assert y.shape == (N, out_channels, H, W), y.shape
    assert bool(jnp.all(jnp.isfinite(y)))

    # Numerical check vs f32 XLA reference (bf16 inputs/weights, f32 accumulate).
    y_ref = double_conv_reference(x, params)
    rel_err = jnp.linalg.norm(y - y_ref) / (jnp.linalg.norm(y_ref) + 1e-8)
    assert float(rel_err) < 3e-2, float(rel_err)

    print("KERNEL_OK")
</pallas_src>

<mosaic_0001>
module attributes {stable_mosaic.version = 11 : i64} {
  func.func @_double_conv_kernel(%arg0: i32, %arg1: i32, %arg2: memref<1x16x16x4xbf16, #tpu.memory_space<vmem>>, %arg3: memref<3x12x64xbf16, #tpu.memory_space<vmem>>, %arg4: memref<1x64xf32, #tpu.memory_space<vmem>>, %arg5: memref<3x192x128xbf16, #tpu.memory_space<vmem>>, %arg6: memref<1x128xf32, #tpu.memory_space<vmem>>, %arg7: memref<1x16x16x128xf32, #tpu.memory_space<vmem>>, %arg8: memref<18x16x12xbf16, #tpu.memory_space<vmem>>, %arg9: memref<18x16x192xbf16, #tpu.memory_space<vmem>>) attributes {dimension_semantics = [#tpu.dimension_semantics<parallel>, #tpu.dimension_semantics<arbitrary>], iteration_bounds = array<i64: 2, 1>, scalar_prefetch = 0 : i64, scratch_operands = 2 : i64, tpu.core_type = #tpu.core_type<tc>, window_params = [{transform_indices = @transform_0, window_bounds = array<i64: 1, 16, 16, 4>}, {pipeline_mode = #tpu.pipeline_mode<synchronous>, transform_indices = @transform_1, window_bounds = array<i64: 3, 12, 64>}, {pipeline_mode = #tpu.pipeline_mode<synchronous>, transform_indices = @transform_2, window_bounds = array<i64: 1, 64>}, {transform_indices = @transform_3, window_bounds = array<i64: 3, 192, 128>}, {transform_indices = @transform_4, window_bounds = array<i64: 1, 128>}, {transform_indices = @transform_5, window_bounds = array<i64: 1, 16, 16, 128>}]} {
    %c0_i32 = arith.constant 0 : i32
    %0 = arith.cmpi eq, %arg1, %c0_i32 : i32
    %1 = arith.extui %0 : i1 to i32
    %c0_i32_0 = arith.constant 0 : i32
    %2 = arith.cmpi ne, %1, %c0_i32_0 : i32
    scf.if %2 {
      %c0_25 = arith.constant 0 : index
      %c0_26 = arith.constant 0 : index
      %c0_27 = arith.constant 0 : index
      %c0_28 = arith.constant 0 : index
      %30 = vector.load %arg2[%c0_25, %c0_26, %c0_27, %c0_28] : memref<1x16x16x4xbf16, #tpu.memory_space<vmem>>, vector<1x16x16x4xbf16>
      %31 = vector.shape_cast %30 : vector<1x16x16x4xbf16> to vector<16x16x4xbf16>
      %cst_29 = arith.constant 0.000000e+00 : bf16
      %32 = vector.broadcast %cst_29 : bf16 to vector<16x1x4xbf16>
      %33 = vector.extract_strided_slice %31 {offsets = [0, 0, 0], sizes = [16, 15, 4], strides = [1, 1, 1]} : vector<16x16x4xbf16> to vector<16x15x4xbf16>
      %34 = tpu.concatenate %32, %33 in 1 : vector<16x1x4xbf16>, vector<16x15x4xbf16> -> vector<16x16x4xbf16>
      %35 = vector.extract_strided_slice %31 {offsets = [0, 1, 0], sizes = [16, 15, 4], strides = [1, 1, 1]} : vector<16x16x4xbf16> to vector<16x15x4xbf16>
      %36 = tpu.concatenate %35, %32 in 1 : vector<16x15x4xbf16>, vector<16x1x4xbf16> -> vector<16x16x4xbf16>
      %37 = tpu.concatenate %34, %31, %36 in 2 : vector<16x16x4xbf16>, vector<16x16x4xbf16>, vector<16x16x4xbf16> -> vector<16x16x12xbf16>
      %cst_30 = arith.constant 0.000000e+00 : bf16
      %38 = vector.broadcast %cst_30 : bf16 to vector<1x16x12xbf16>
      %39 = tpu.concatenate %38, %37, %38 in 0 : vector<1x16x12xbf16>, vector<16x16x12xbf16>, vector<1x16x12xbf16> -> vector<18x16x12xbf16>
      %c0_31 = arith.constant 0 : index
      %c0_32 = arith.constant 0 : index
      %c0_33 = arith.constant 0 : index
      %40 = vector.load %arg8[%c0_31, %c0_32, %c0_33] : memref<18x16x12xbf16, #tpu.memory_space<vmem>>, vector<18x16x12xbf16>
      tpu.vector_store %arg8[%c0_31, %c0_32, %c0_33], %39 {strides = array<i32>} : memref<18x16x12xbf16, #tpu.memory_space<vmem>>, vector<18x16x12xbf16>,
      %c0_34 = arith.constant 0 : index
      %c0_35 = arith.constant 0 : index
      %41 = vector.load %arg4[%c0_34, %c0_35] : memref<1x64xf32, #tpu.memory_space<vmem>>, vector<1x64xf32>
      %42 = vector.shape_cast %41 : vector<1x64xf32> to vector<1x64xf32>
      %43 = vector.broadcast %42 : vector<1x64xf32> to vector<256x64xf32>
      %c0_36 = arith.constant 0 : index
      %c0_37 = arith.constant 0 : index
      %c0_38 = arith.constant 0 : index
      %44 = vector.load %arg8[%c0_36, %c0_37, %c0_38] : memref<18x16x12xbf16, #tpu.memory_space<vmem>>, vector<16x16x12xbf16>
      %45 = vector.shape_cast %44 : vector<16x16x12xbf16> to vector<256x12xbf16>
      %c0_39 = arith.constant 0 : index
      %c0_40 = arith.constant 0 : index
      %c0_41 = arith.constant 0 : index
      %46 = vector.load %arg3[%c0_39, %c0_40, %c0_41] : memref<3x12x64xbf16, #tpu.memory_space<vmem>>, vector<1x12x64xbf16>
      %47 = vector.shape_cast %46 : vector<1x12x64xbf16> to vector<12x64xbf16>
      %cst_42 = arith.constant dense<0.000000e+00> : vector<256x64xf32>
      %48 = tpu.matmul %45, %47, %cst_42 {dimension_numbers = #tpu.dot_dimension_numbers<[1], [0], [0], [1], [0, 0, 1, 1], [], []>} : vector<256x12xbf16>, vector<12x64xbf16>, vector<256x64xf32> -> vector<256x64xf32>
      %49 = arith.addf %43, %48 : vector<256x64xf32>
      %c1_43 = arith.constant 1 : index
      %c0_44 = arith.constant 0 : index
      %c0_45 = arith.constant 0 : index
      %50 = vector.load %arg8[%c1_43, %c0_44, %c0_45] : memref<18x16x12xbf16, #tpu.memory_space<vmem>>, vector<16x16x12xbf16>
      %51 = vector.shape_cast %50 : vector<16x16x12xbf16> to vector<256x12xbf16>
      %c1_46 = arith.constant 1 : index
      %c0_47 = arith.constant 0 : index
      %c0_48 = arith.constant 0 : index
      %52 = vector.load %arg3[%c1_46, %c0_47, %c0_48] : memref<3x12x64xbf16, #tpu.memory_space<vmem>>, vector<1x12x64xbf16>
      %53 = vector.shape_cast %52 : vector<1x12x64xbf16> to vector<12x64xbf16>
      %cst_49 = arith.constant dense<0.000000e+00> : vector<256x64xf32>
      %54 = tpu.matmul %51, %53, %cst_49 {dimension_numbers = #tpu.dot_dimension_numbers<[1], [0], [0], [1], [0, 0, 1, 1], [], []>} : vector<256x12xbf16>, vector<12x64xbf16>, vector<256x64xf32> -> vector<256x64xf32>
      %55 = arith.addf %49, %54 : vector<256x64xf32>
      %c2_50 = arith.constant 2 : index
      %c0_51 = arith.constant 0 : index
      %c0_52 = arith.constant 0 : index
      %56 = vector.load %arg8[%c2_50, %c0_51, %c0_52] : memref<18x16x12xbf16, #tpu.memory_space<vmem>>, vector<16x16x12xbf16>
      %57 = vector.shape_cast %56 : vector<16x16x12xbf16> to vector<256x12xbf16>
      %c2_53 = arith.constant 2 : index
      %c0_54 = arith.constant 0 : index
      %c0_55 = arith.constant 0 : index
      %58 = vector.load %arg3[%c2_53, %c0_54, %c0_55] : memref<3x12x64xbf16, #tpu.memory_space<vmem>>, vector<1x12x64xbf16>
      %59 = vector.shape_cast %58 : vector<1x12x64xbf16> to vector<12x64xbf16>
      %cst_56 = arith.constant dense<0.000000e+00> : vector<256x64xf32>
      %60 = tpu.matmul %57, %59, %cst_56 {dimension_numbers = #tpu.dot_dimension_numbers<[1], [0], [0], [1], [0, 0, 1, 1], [], []>} : vector<256x12xbf16>, vector<12x64xbf16>, vector<256x64xf32> -> vector<256x64xf32>
      %61 = arith.addf %55, %60 : vector<256x64xf32>
      %cst_57 = arith.constant 0.000000e+00 : f32
      %62 = vector.broadcast %cst_57 : f32 to vector<256x64xf32>
      %63 = arith.maximumf %61, %62 : vector<256x64xf32>
      %64 = arith.truncf %63 : vector<256x64xf32> to vector<256x64xbf16>
      %65 = vector.shape_cast %64 : vector<256x64xbf16> to vector<16x16x64xbf16>
      %cst_58 = arith.constant 0.000000e+00 : bf16
      %66 = vector.broadcast %cst_58 : bf16 to vector<16x1x64xbf16>
      %67 = vector.extract_strided_slice %65 {offsets = [0, 0, 0], sizes = [16, 15, 64], strides = [1, 1, 1]} : vector<16x16x64xbf16> to vector<16x15x64xbf16>
      %68 = tpu.concatenate %66, %67 in 1 : vector<16x1x64xbf16>, vector<16x15x64xbf16> -> vector<16x16x64xbf16>
      %69 = vector.extract_strided_slice %65 {offsets = [0, 1, 0], sizes = [16, 15, 64], strides = [1, 1, 1]} : vector<16x16x64xbf16> to vector<16x15x64xbf16>
      %70 = tpu.concatenate %69, %66 in 1 : vector<16x15x64xbf16>, vector<16x1x64xbf16> -> vector<16x16x64xbf16>
      %71 = tpu.concatenate %68, %65, %70 in 2 : vector<16x16x64xbf16>, vector<16x16x64xbf16>, vector<16x16x64xbf16> -> vector<16x16x192xbf16>
      %cst_59 = arith.constant 0.000000e+00 : bf16
      %72 = vector.broadcast %cst_59 : bf16 to vector<1x16x192xbf16>
      %73 = tpu.concatenate %72, %71, %72 in 0 : vector<1x16x192xbf16>, vector<16x16x192xbf16>, vector<1x16x192xbf16> -> vector<18x16x192xbf16>
      %c0_60 = arith.constant 0 : index
      %c0_61 = arith.constant 0 : index
      %c0_62 = arith.constant 0 : index
      %74 = vector.load %arg9[%c0_60, %c0_61, %c0_62] : memref<18x16x192xbf16, #tpu.memory_space<vmem>>, vector<18x16x192xbf16>
      tpu.vector_store %arg9[%c0_60, %c0_61, %c0_62], %73 {strides = array<i32>} : memref<18x16x192xbf16, #tpu.memory_space<vmem>>, vector<18x16x192xbf16>,
    } else {
    }
    %c0 = arith.constant 0 : index
    %c0_1 = arith.constant 0 : index
    %3 = vector.load %arg6[%c0, %c0_1] : memref<1x128xf32, #tpu.memory_space<vmem>>, vector<1x128xf32>
    %4 = vector.shape_cast %3 : vector<1x128xf32> to vector<1x128xf32>
    %5 = vector.broadcast %4 : vector<1x128xf32> to vector<256x128xf32>
    %c0_2 = arith.constant 0 : index
    %c0_3 = arith.constant 0 : index
    %c0_4 = arith.constant 0 : index
    %6 = vector.load %arg9[%c0_2, %c0_3, %c0_4] : memref<18x16x192xbf16, #tpu.memory_space<vmem>>, vector<16x16x192xbf16>
    %7 = vector.shape_cast %6 : vector<16x16x192xbf16> to vector<256x192xbf16>
    %c0_5 = arith.constant 0 : index
    %c0_6 = arith.constant 0 : index
    %c0_7 = arith.constant 0 : index
    %8 = vector.load %arg5[%c0_5, %c0_6, %c0_7] : memref<3x192x128xbf16, #tpu.memory_space<vmem>>, vector<1x192x128xbf16>
    %9 = vector.shape_cast %8 : vector<1x192x128xbf16> to vector<192x128xbf16>
    %cst = arith.constant dense<0.000000e+00> : vector<256x128xf32>
    %10 = tpu.matmul %7, %9, %cst {dimension_numbers = #tpu.dot_dimension_numbers<[1], [0], [0], [1], [0, 0, 1, 1], [], []>} : vector<256x192xbf16>, vector<192x128xbf16>, vector<256x128xf32> -> vector<256x128xf32>
    %11 = arith.addf %5, %10 : vector<256x128xf32>
    %c1 = arith.constant 1 : index
    %c0_8 = arith.constant 0 : index
    %c0_9 = arith.constant 0 : index
    %12 = vector.load %arg9[%c1, %c0_8, %c0_9] : memref<18x16x192xbf16, #tpu.memory_space<vmem>>, vector<16x16x192xbf16>
    %13 = vector.shape_cast %12 : vector<16x16x192xbf16> to vector<256x192xbf16>
    %c1_10 = arith.constant 1 : index
    %c0_11 = arith.constant 0 : index
    %c0_12 = arith.constant 0 : index
    %14 = vector.load %arg5[%c1_10, %c0_11, %c0_12] : memref<3x192x128xbf16, #tpu.memory_space<vmem>>, vector<1x192x128xbf16>
    %15 = vector.shape_cast %14 : vector<1x192x128xbf16> to vector<192x128xbf16>
    %cst_13 = arith.constant dense<0.000000e+00> : vector<256x128xf32>
    %16 = tpu.matmul %13, %15, %cst_13 {dimension_numbers = #tpu.dot_dimension_numbers<[1], [0], [0], [1], [0, 0, 1, 1], [], []>} : vector<256x192xbf16>, vector<192x128xbf16>, vector<256x128xf32> -> vector<256x128xf32>
    %17 = arith.addf %11, %16 : vector<256x128xf32>
    %c2 = arith.constant 2 : index
    %c0_14 = arith.constant 0 : index
    %c0_15 = arith.constant 0 : index
    %18 = vector.load %arg9[%c2, %c0_14, %c0_15] : memref<18x16x192xbf16, #tpu.memory_space<vmem>>, vector<16x16x192xbf16>
    %19 = vector.shape_cast %18 : vector<16x16x192xbf16> to vector<256x192xbf16>
    %c2_16 = arith.constant 2 : index
    %c0_17 = arith.constant 0 : index
    %c0_18 = arith.constant 0 : index
    %20 = vector.load %arg5[%c2_16, %c0_17, %c0_18] : memref<3x192x128xbf16, #tpu.memory_space<vmem>>, vector<1x192x128xbf16>
    %21 = vector.shape_cast %20 : vector<1x192x128xbf16> to vector<192x128xbf16>
    %cst_19 = arith.constant dense<0.000000e+00> : vector<256x128xf32>
    %22 = tpu.matmul %19, %21, %cst_19 {dimension_numbers = #tpu.dot_dimension_numbers<[1], [0], [0], [1], [0, 0, 1, 1], [], []>} : vector<256x192xbf16>, vector<192x128xbf16>, vector<256x128xf32> -> vector<256x128xf32>
    %23 = arith.addf %17, %22 : vector<256x128xf32>
    %cst_20 = arith.constant 0.000000e+00 : f32
    %24 = vector.broadcast %cst_20 : f32 to vector<256x128xf32>
    %25 = arith.maximumf %23, %24 : vector<256x128xf32>
    %26 = vector.shape_cast %25 : vector<256x128xf32> to vector<16x16x128xf32>
    %c0_21 = arith.constant 0 : index
    %c0_22 = arith.constant 0 : index
    %c0_23 = arith.constant 0 : index
    %c0_24 = arith.constant 0 : index
    %27 = vector.load %arg7[%c0_21, %c0_22, %c0_23, %c0_24] : memref<1x16x16x128xf32, #tpu.memory_space<vmem>>, vector<1x16x16x128xf32>
    %28 = vector.shape_cast %27 : vector<1x16x16x128xf32> to vector<16x16x128xf32>
    %29 = vector.shape_cast %26 : vector<16x16x128xf32> to vector<1x16x16x128xf32>
    tpu.vector_store %arg7[%c0_21, %c0_22, %c0_23, %c0_24], %29 {strides = array<i32>} : memref<1x16x16x128xf32, #tpu.memory_space<vmem>>, vector<1x16x16x128xf32>,
    return
  }
  func.func @transform_0(%arg0: i32, %arg1: i32) -> (i32, i32, i32, i32) {
    %c0_i32 = arith.constant 0 : i32
    %c0_i32_0 = arith.constant 0 : i32
    %c0_i32_1 = arith.constant 0 : i32
    %c0_i32_2 = arith.constant 0 : i32
    return %arg0, %c0_i32, %c0_i32_0, %c0_i32_1 : i32, i32, i32, i32
  }
  func.func @transform_1(%arg0: i32, %arg1: i32) -> (i32, i32, i32) {
    %c0_i32 = arith.constant 0 : i32
    %c0_i32_0 = arith.constant 0 : i32
    %c0_i32_1 = arith.constant 0 : i32
    %c0_i32_2 = arith.constant 0 : i32
    return %c0_i32, %c0_i32_0, %c0_i32_1 : i32, i32, i32
  }
  func.func @transform_2(%arg0: i32, %arg1: i32) -> (i32, i32) {
    %c0_i32 = arith.constant 0 : i32
    %c0_i32_0 = arith.constant 0 : i32
    %c0_i32_1 = arith.constant 0 : i32
    return %c0_i32, %c0_i32_0 : i32, i32
  }
  func.func @transform_3(%arg0: i32, %arg1: i32) -> (i32, i32, i32) {
    %c0_i32 = arith.constant 0 : i32
    %c0_i32_0 = arith.constant 0 : i32
    %c0_i32_1 = arith.constant 0 : i32
    return %c0_i32, %c0_i32_0, %arg1 : i32, i32, i32
  }
  func.func @transform_4(%arg0: i32, %arg1: i32) -> (i32, i32) {
    %c0_i32 = arith.constant 0 : i32
    %c0_i32_0 = arith.constant 0 : i32
    return %c0_i32, %arg1 : i32, i32
  }
  func.func @transform_5(%arg0: i32, %arg1: i32) -> (i32, i32, i32, i32) {
    %c0_i32 = arith.constant 0 : i32
    %c0_i32_0 = arith.constant 0 : i32
    %c0_i32_1 = arith.constant 0 : i32
    return %arg0, %c0_i32, %c0_i32_0, %arg1 : i32, i32, i32, i32
  }
}

</mosaic_0001>

<bundles_post_ra>
// kernel: double_conv_forward.1
= control target key start
LH: loop header
LB: loop body
LE: loop exit
PB: predicated region body
PF: predicated region fallthrough
CT: control target
= control target key end

     0   :  { %s4079_s18 = smov 0   ;;  %s4081_s19 = smov 0   ;;  %s5292_s0 = inlined_call_operand.vmem [shape: bf16[2,16,16,4], index: 0, kind: input, shape index: {}]   ;;  %s5293_s1 = inlined_call_operand.vmem [shape: bf16[3,12,64], index: 1, kind: input, shape index: {}]   ;;  %s5294_s2 = inlined_call_operand.vmem [shape: f32[1,64], index: 2, kind: input, shape index: {}]   ;;  %s5295_s3 = inlined_call_operand.vmem [shape: bf16[3,192,128], index: 3, kind: input, shape index: {}]   ;;  %s5296_s4 = inlined_call_operand.vmem [shape: f32[1,128], index: 4, kind: input, shape index: {}]   ;;  %s5297_s5 = inlined_call_operand.vmem [shape: f32[2,16,16,128], index: 5, kind: output, shape index: {}]  }
   0x1   :  { %s4083_s20 = smov 0  }
   0x2 LB: > { %s27_s21 = sadd.s32 1, %s4039_s19  ;;  %p3316_p0 = scmp.ge.s32.totalorder %s4043_s20, 1  ;;  %s4043_s20 = sphi %s4083_s20, %s15_s20   ;;  %s4039_s19 = sphi %s4081_s19, %s5303_s19   ;;  %s4035_s18 = sphi %s4079_s18, %s5302_s18  }
   0x3   : > { %p29_p1 = scmp.ge.s32.totalorder %s27_s21, 2  ;;  %p218_p2 = scmp.lt.s32.totalorder %s4043_s20, 3 }
   0x5   : > { %s5305_s21 = smov (%p29_p1, %s27_s21), 0  ;;  %p219_p3 = pnand %p3316_p0, %p218_p2 }
   0x6   : > { %p256_p4 = scmp.lt.s32.totalorder (!%p219_p3), %s4035_s18, 1  ;;  %vm589_vm0 = vsmask.f32 (!%p219_p3), 7424  ;;  %vm785_vm1 = vcmask (!%p219_p3), 97280   ;;  %v4045_v0 = vmov (!%p219_p3), 0   ;;  %vm588_vm2 = vcmask (!%p219_p3), 1047552  }
   0x7   : > { %222 = sbr.rel (%p219_p3) target bundleno = 1085 (0x43d), region = 40  ;;  %786 = vst.msk [vmem:[#allocation2] sm:$0xff] (!%p219_p3), %vm785_vm1, %v4045_v0  ;;  %803 = vst.msk [vmem:[#allocation2 + $0x88] sm:$0xff] (!%p219_p3), %vm785_vm1, %v4045_v0  ;;  %2206 = vmatprep.subr.bf16.mxu1 (!%p219_p3), %v4045_v0  ;;  %v3979_v1 = vld [vmem:[%s5293_s1] sm:$0x3f] (!%p219_p3)   ;;  %vm882_vm3 = vcmask (!%p219_p3), 1045504  }
   0x8   : > { %1986 = vst [vmem:[#allocation3] sm:$0xff] (!%p219_p3), %v4045_v0  ;;  %3933 = vmatprep.subr.msk.bf16.mxu0 (!%p219_p3), %vm882_vm3, %v3979_v1  ;;  %v884_v4 = vsel (!%p219_p3), %vm882_vm3, %v3979_v1, 0  ;;  %s4046_s28 = smov (!%p219_p3), 4   ;;  %vm4124_vm4 = vmand (!%p219_p3), %vm588_vm2, %vm589_vm0  ;;  %s4047_s29 = smov (!%p219_p3), 8   ;;  %vm521_vm5 = vcmask (!%p219_p3), 1040384   ;;  %vm687_vm8 = vcmask (!%p219_p3), 31744  }
   0x9   : > { %3582 = vmatpush3.bf16.msra.mxu0 (!%p219_p3), %v884_v4  ;;  %vm522_vm6 = vsmask.f32 (!%p219_p3), 256  ;;  %vm736_vm9 = vcmask (!%p219_p3), 64512   ;;  %vm1921_vm10 = vcmask (!%p219_p3), 523264   ;;  %v4018_v13 = vld [vmem:[%s5295_s3 + $0xb8] sm:$0xff] (!%p219_p3)  }
   0xa   : > { %vm4287_vm7 = vmand (!%p219_p3), %vm521_vm5, %vm522_vm6  ;;  %1987 = vst.msk [vmem:[#allocation3 + $0x8] sm:$0xff] (!%p219_p3), %vm1921_vm10, %v4045_v0 }
   0xb   : > { %2021 = vst.msk [vmem:[#allocation3 + $0x118] sm:$0xff] (!%p219_p3), %vm1921_vm10, %v4045_v0 }
   0xe   : > { %s5307_s18 = smov (!%p256_p4, %s4035_s18), 1 }
   0xf   : > { %s3528_s22 = sshll.u32 %s5307_s18, 7  ;;  %s3529_s27 = sshll.u32 %s5307_s18, 8 }
  0x10   : > { %s4109_s25 = scalar_lea.vmem %s5292_s0, %s3528_s22  ;;  %s5190_s30 = scalar_lea.vmem %s5297_s5, %s3529_s27 }
  0x11   : > { %v3964_v2 = vld [vmem:[%s4109_s25] sm:$0xff]   ;;  %v3965_v3 = vld [vmem:[%s4109_s25 + $0x8] sm:$0xff]   ;;  %v3966_v7 = vld [vmem:[%s4109_s25 + $0x10] sm:$0xff]  }
  0x12   : > { %607 = vrot.lane.b32.xlu0 %v3964_v2, %s4046_s28  ;;  %v394_v5 = vshrl.u32 %v3964_v2, 16  ;;  %v397_v6 = vshll.u32 %v3964_v2, 16  ;;  %609 = vrot.lane.b32.xlu1 %v3965_v3, %s4046_s28  ;;  %v401_v8 = vshrl.u32 %v3965_v3, 16  ;;  %v404_v9 = vshll.u32 %v3965_v3, 16  ;;  %v3967_v10 = vld [vmem:[%s4109_s25 + $0x18] sm:$0xff]   ;;  %v3968_v19 = vld [vmem:[%s4109_s25 + $0x20] sm:$0xff]  }
  0x13   : > { %v408_v16 = vshrl.u32 %v3966_v7, 16  ;;  %v411_v17 = vshll.u32 %v3966_v7, 16  ;;  %v418_v20 = vshll.u32 %v3967_v10, 16  ;;  %v422_v28 = vshrl.u32 %v3968_v19, 16  ;;  %v4138_v30 = vld [vmem:[%s4109_s25 + $0x30] sm:$0xff]   ;;  %v3969_v34 = vld [vmem:[%s4109_s25 + $0x28] sm:$0xff]  }
  0x14   : > { %v540_v11 = vrot.slane %v397_v6, 1  ;;  %v396_v12 = vrot.slane %v394_v5, 7  ;;  %v403_v14 = vrot.slane %v401_v8, 7  ;;  %v542_v15 = vrot.slane %v404_v9, 1  ;;  %v4148_v38 = vld [vmem:[%s4109_s25 + $0x38] sm:$0xff]   ;;  %v4152_v39 = vld [vmem:[%s4109_s25 + $0x40] sm:$0xff]  }
  0x15   : > { %v410_v23 = vrot.slane %v408_v16, 7  ;;  %v544_v24 = vrot.slane %v411_v17, 1  ;;  %v425_v29 = vshll.u32 %v3968_v19, 16  ;;  %v415_v32 = vshrl.u32 %v3967_v10, 16  ;;  %v4160_v49 = vld [vmem:[%s4109_s25 + $0x48] sm:$0xff]   ;;  %v4163_v50 = vld [vmem:[%s4109_s25 + $0x50] sm:$0xff]  }
  0x16   : > { %v541_v18 = vor.u32 %v540_v11, %v394_v5  ;;  %v4129_v21 = vor.u32 %v397_v6, %v396_v12  ;;  %611 = vrot.lane.b32.xlu1 %v3966_v7, %s4046_s28  ;;  %v543_v22 = vor.u32 %v542_v15, %v401_v8  ;;  %v4132_v25 = vor.u32 %v404_v9, %v403_v14  ;;  %v4179_v60 = vld [vmem:[%s4109_s25 + $0x58] sm:$0xff]   ;;  %v3976_v14 = vld [vmem:[%s4109_s25 + $0x60] sm:$0xff]  }
  0x17   : > { %v545_v27 = vor.u32 %v544_v24, %v408_v16  ;;  %v546_v33 = vrot.slane %v418_v20, 1  ;;  %v4143_v35 = vor.u32 %v411_v17, %v410_v23  ;;  %v548_v37 = vrot.slane %v425_v29, 1  ;;  %v3977_v24 = vld [vmem:[%s4109_s25 + $0x68] sm:$0xff]  }
  0x18   : > { %v591_v26 = vsel %vm4124_vm4, %v541_v18, 0  ;;  %v592_v31 = vsel %vm4124_vm4, %v543_v22, 0  ;;  %v439_v41 = vshll.u32 %v4138_v30, 16  ;;  %v417_v42 = vrot.slane %v415_v32, 7  ;;  %v811_v18 = vld [vmem:[#allocation2] sm:$0xff] }
  0x19   : > { %655 = vrot.lane.b32.xlu0 %v591_v26, %s4047_s29  ;;  %v593_v36 = vsel %vm4124_vm4, %v545_v27, 0  ;;  %v549_v40 = vor.u32 %v548_v37, %v422_v28  ;;  %v547_v43 = vor.u32 %v546_v33, %v415_v32  ;;  %v432_v44 = vshll.u32 %v3969_v34, 16  ;;  %3583 = vmatprep.mubr.msk.bf16.mxu0 %vm785_vm1, %v811_v18 }
  0x1a   : > { %659 = vrot.lane.b32.xlu1 %v593_v36, %s4047_s29  ;;  %v429_v45 = vshrl.u32 %v3969_v34, 16  ;;  %v446_v46 = vshll.u32 %v4148_v38, 16  ;;  %v424_v47 = vrot.slane %v422_v28, 7  ;;  %v453_v48 = vshll.u32 %v4152_v39, 16 }
  0x1b   : > { %v595_v51 = vsel %vm4124_vm4, %v549_v40, 0  ;;  %v436_v53 = vshrl.u32 %v4138_v30, 16  ;;  %v552_v54 = vrot.slane %v439_v41, 1  ;;  %v594_v55 = vsel %vm4124_vm4, %v547_v43, 0  ;;  %v3978_v40 = vld [vmem:[%s4109_s25 + $0x70] sm:$0xff]  }
  0x1c   : > { %v431_v52 = vrot.slane %v429_v45, 7  ;;  %v550_v56 = vrot.slane %v432_v44, 1  ;;  %v4173_v57 = vor.u32 %v418_v20, %v417_v42  ;;  %v443_v58 = vshrl.u32 %v4148_v38, 16 }
  0x1d   : > { %657 = vrot.lane.b32.xlu0 %v592_v31, %s4047_s29  ;;  %v554_v59 = vrot.slane %v446_v46, 1  ;;  %v450_v61 = vshrl.u32 %v4152_v39, 16  ;;  %v556_v62 = vrot.slane %v453_v48, 1  ;;  %v460_v63 = vshll.u32 %v4160_v49, 16 }
  0x1e   : > { %615 = vrot.lane.b32.xlu1 %v3968_v19, %s4046_s28  ;;  %v467_v1 = vshll.u32 %v4163_v50, 16  ;;  %v553_v2 = vor.u32 %v552_v54, %v436_v53  ;;  %v4186_v3 = vor.u32 %v425_v29, %v424_v47  ;;  %v551_v4 = vor.u32 %v550_v56, %v429_v45  ;;  %v4202_v19 = vld [vmem:[%s5293_s1 + $0x8] sm:$0x3f]  }
  0x1f   : > { %v4188_v5 = vor.u32 %v432_v44, %v431_v52  ;;  %v555_v6 = vor.u32 %v554_v59, %v443_v58  ;;  %v457_v7 = vshrl.u32 %v4160_v49, 16  ;;  %v474_v8 = vshll.u32 %v4179_v60, 16  ;;  %3934 = vmatprep.subr.msk.bf16.mxu0 %vm882_vm3, %v4202_v19 }
  0x20   : > { %v557_v9 = vor.u32 %v556_v62, %v450_v61  ;;  %v464_v11 = vshrl.u32 %v4163_v50, 16  ;;  %v560_v12 = vrot.slane %v467_v1, 1  ;;  %v438_v15 = vrot.slane %v436_v53, 7 }
  0x21   : > { %613 = vrot.lane.b32.xlu0 %v3967_v10, %s4046_s28  ;;  %v558_v10 = vrot.slane %v460_v63, 1  ;;  %v597_v16 = vsel %vm4124_vm4, %v553_v2, 0  ;;  %v445_v17 = vrot.slane %v443_v58, 7  ;;  %v596_v20 = vsel %vm4124_vm4, %v551_v4, 0  ;;  %v4241_v58 = vld [vmem:[%s4109_s25 + $0x78] sm:$0xff]   ;;  %s4048_s25 = smov 64  }
  0x22   : > { %663 = vrot.lane.b32.xlu1 %v595_v51, %s4047_s29  ;;  %v452_v22 = vrot.slane %v450_v61, 7  ;;  %v459_v23 = vrot.slane %v457_v7, 7  ;;  %v598_v26 = vsel %vm4124_vm4, %v555_v6, 0  ;;  %v466_v27 = vrot.slane %v464_v11, 7 }
  0x23   : > { %v471_v28 = vshrl.u32 %v4179_v60, 16  ;;  %v562_v29 = vrot.slane %v474_v8, 1  ;;  %v599_v31 = vsel %vm4124_vm4, %v557_v9, 0  ;;  %v559_v32 = vor.u32 %v558_v10, %v457_v7 }
  0x24   : > { %v561_v33 = vor.u32 %v560_v12, %v464_v11  ;;  %v478_v37 = vshrl.u32 %v3976_v14, 16  ;;  %v485_v42 = vshrl.u32 %v3977_v24, 16  ;;  %v488_v43 = vshll.u32 %v3977_v24, 16 }
  0x25   : > { %661 = vrot.lane.b32.xlu0 %v594_v55, %s4047_s29  ;;  %v473_v36 = vrot.slane %v471_v28, 7  ;;  %v4220_v44 = vor.u32 %v439_v41, %v438_v15  ;;  %v4224_v45 = vor.u32 %v446_v46, %v445_v17  ;;  %v4226_v47 = vor.u32 %v453_v48, %v452_v22 }
  0x26   : > { %619 = vrot.lane.b32.xlu1 %v4138_v30, %s4046_s28  ;;  %v563_v51 = vor.u32 %v562_v29, %v471_v28  ;;  %v4228_v52 = vor.u32 %v460_v63, %v459_v23  ;;  %v4230_v53 = vor.u32 %v467_v1, %v466_v27  ;;  %v600_v30 = vsel %vm4124_vm4, %v559_v32, 0 }
  0x27   : > { %v601_v41 = vsel %vm4124_vm4, %v561_v33, 0  ;;  %v480_v54 = vrot.slane %v478_v37, 7  ;;  %v487_v46 = vrot.slane %v485_v42, 7  ;;  %v492_v48 = vshrl.u32 %v3978_v40, 16 }
  0x28   : > { %v495_v56 = vshll.u32 %v3978_v40, 16  ;;  %v4243_v59 = vor.u32 %v474_v8, %v473_v36  ;;  %v566_v61 = vrot.slane %v488_v43, 1  ;;  %v499_v8 = vshrl.u32 %v4241_v58, 16 }
  0x29   : > { %617 = vrot.lane.b32.xlu0 %v3969_v34, %s4046_s28  ;;  %v481_v34 = vshll.u32 %v3976_v14, 16  ;;  %v494_v63 = vrot.slane %v492_v48, 7  ;;  %v4256_v2 = vor.u32 %v488_v43, %v487_v46  ;;  %v524_v17 = vsel %vm4287_vm7, 0, %v4129_v21 }
  0x2a   : > { %667 = vrot.lane.b32.xlu1 %v597_v16, %s4047_s29  ;;  %v568_v6 = vrot.slane %v495_v56, 1  ;;  %v567_v9 = vor.u32 %v566_v61, %v485_v42  ;;  %v526_v18 = vsel %vm4287_vm7, 0, %v4143_v35  ;;  %v527_v32 = vsel %vm4287_vm7, 0, %v4173_v57 }
  0x2b   : > { %v564_v55 = vrot.slane %v481_v34, 1  ;;  %v4248_v62 = vor.u32 %v481_v34, %v480_v54  ;;  %v4261_v7 = vor.u32 %v495_v56, %v494_v63  ;;  %v1153_v36 = vsel %vm882_vm3, %v4202_v19, 0 }
  0x2c   : > { %v604_v12 = vsel %vm4124_vm4, %v567_v9, 0  ;;  %v529_v54 = vsel %vm4287_vm7, 0, %v4188_v5 }
  0x2d   : > { %665 = vrot.lane.b32.xlu0 %v596_v20, %s4047_s29  ;;  %v565_v1 = vor.u32 %v564_v55, %v478_v37  ;;  %v4320_v37 = vld [vmem:[%s5293_s1 + $0x10] sm:$0x3f]  }
  0x2e   : > { %623 = vrot.lane.b32.xlu1 %v4152_v39, %s4046_s28  ;;  %v602_v39 = vsel %vm4124_vm4, %v563_v51, 0 }
  0x2f   : > { %v603_v4 = vsel %vm4124_vm4, %v565_v1, 0 }
  0x31   : > { %621 = vrot.lane.b32.xlu0 %v4148_v38, %s4046_s28  ;;  %v502_v38 = vshll.u32 %v4241_v58, 16 }
  0x32   : > { %671 = vrot.lane.b32.xlu1 %v599_v31, %s4047_s29 }
  0x35   : > { %669 = vrot.lane.b32.xlu0 %v598_v26, %s4047_s29 }
  0x36   : > { %627 = vrot.lane.b32.xlu1 %v4163_v50, %s4046_s28  ;;  %v570_v50 = vrot.slane %v502_v38, 1 }
  0x38   : > { %v571_v11 = vor.u32 %v570_v50, %v499_v8 }
  0x39   : > { %625 = vrot.lane.b32.xlu0 %v4160_v49, %s4046_s28  ;;  %v569_v49 = vor.u32 %v568_v6, %v492_v48  ;;  %v531_v6 = vsel %vm4287_vm7, 0, %v4224_v45 }
  0x3a   : > { %675 = vrot.lane.b32.xlu1 %v601_v41, %s4047_s29  ;;  %v530_v41 = vsel %vm4287_vm7, 0, %v4220_v44 }
  0x3b   : > { %v605_v10 = vsel %vm4124_vm4, %v569_v49, 0 }
  0x3d   : > { %673 = vrot.lane.b32.xlu0 %v600_v30, %s4047_s29 }
  0x3e   : > { %631 = vrot.lane.b32.xlu1 %v3976_v14, %s4046_s28 }
  0x41   : > { %629 = vrot.lane.b32.xlu0 %v4179_v60, %s4046_s28  ;;  %v606_v60 = vsel %vm4124_vm4, %v571_v11, 0 }
  0x42   : > { %679 = vrot.lane.b32.xlu1 %v603_v4, %s4047_s29  ;;  %v532_v4 = vsel %vm4287_vm7, 0, %v4226_v47 }
  0x45   : > { %677 = vrot.lane.b32.xlu0 %v602_v39, %s4047_s29 }
  0x46   : > { %635 = vrot.lane.b32.xlu1 %v3978_v40, %s4046_s28 }
  0x49   : > { %633 = vrot.lane.b32.xlu0 %v3977_v24, %s4046_s28  ;;  %v525_v24 = vsel %vm4287_vm7, 0, %v4132_v25  ;;  %v528_v25 = vsel %vm4287_vm7, 0, %v4186_v3 }
  0x4a   : > { %683 = vrot.lane.b32.xlu1 %v605_v10, %s4047_s29 }
  0x4d   : > { %681 = vrot.lane.b32.xlu0 %v604_v12, %s4047_s29 }
  0x4e   : > { %685 = vrot.lane.b32.xlu1 %v606_v60, %s4047_s29 }
  0x51   : > { %637 = vrot.lane.b32.xlu0 %v4241_v58, %s4046_s28 }
  0x84   : > { %v608_v15 = vpop.permute.xlu0 %607  ;;  %v610_v16 = vpop.permute.xlu1 %609 }
  0x85   : > { %v690_v22 = vsel %vm687_vm8, %v524_v17, %v608_v15  ;;  %v693_v28 = vsel %vm687_vm8, %v525_v24, %v610_v16  ;;  %v534_v16 = vsel %vm4287_vm7, 0, %v4230_v53  ;;  %v533_v17 = vsel %vm4287_vm7, 0, %v4228_v52 }
  0x88   : > { %v612_v20 = vpop.permute.xlu1 %611 }
  0x89   : > { %v696_v27 = vsel %vm687_vm8, %v526_v18, %v612_v20 }
  0x8b   : > { %v656_v23 = vpop.permute.xlu0 %655 }
  0x8c   : > { %v738_v26 = vsel %vm736_vm9, %v690_v22, %v656_v23  ;;  %v660_v21 = vpop.permute.xlu1 %659 }
  0x8d   : > { %787 = vst.msk [vmem:[#allocation2 + $0x8] sm:$0xff] %vm785_vm1, %v738_v26  ;;  %v744_v35 = vsel %vm736_vm9, %v696_v27, %v660_v21 }
  0x8e   : > { %789 = vst.msk [vmem:[#allocation2 + $0x18] sm:$0xff] %vm785_vm1, %v744_v35 }
  0x8f   : > { %v658_v29 = vpop.permute.xlu0 %657 }
  0x90   : > { %v741_v31 = vsel %vm736_vm9, %v693_v28, %v658_v29  ;;  %v616_v33 = vpop.permute.xlu1 %615  ;;  %v536_v28 = vsel %vm4287_vm7, 0, %v4248_v62  ;;  %v535_v29 = vsel %vm4287_vm7, 0, %v4243_v59 }
  0x91   : > { %788 = vst.msk [vmem:[#allocation2 + $0x10] sm:$0xff] %vm785_vm1, %v741_v31  ;;  %v702_v40 = vsel %vm687_vm8, %v528_v25, %v616_v33 }
  0x93   : > { %v614_v34 = vpop.permute.xlu0 %613 }
  0x94   : > { %v4323_v42 = vld [vmem:[#allocation2 + $0x8] sm:$0xff]  ;;  %v699_v3 = vsel %vm687_vm8, %v527_v32, %v614_v34  ;;  %v664_v57 = vpop.permute.xlu1 %663 }
  0x95   : > { %3584 = vmatmul.mubr.msk.bf16.vlgmr.msra.gmra.mrb[0].mxu0 %vm785_vm1, %v4323_v42  ;;  %v750_v51 = vsel %vm736_vm9, %v702_v40, %v664_v57  ;;  %v4345_v56 = vld [vmem:[#allocation2 + $0x18] sm:$0xff]  ;;  %v538_v57 = vsel %vm4287_vm7, 0, %v4261_v7 }
  0x96   : > { %3616 = vmatpush3.bf16.msra.mxu0 %v1153_v36  ;;  %791 = vst.msk [vmem:[#allocation2 + $0x28] sm:$0xff] %vm785_vm1, %v750_v51 }
  0x97   : > { %v662_v43 = vpop.permute.xlu0 %661  ;;  %3935 = vmatprep.subr.msk.bf16.mxu0 %vm882_vm3, %v4320_v37 }
  0x98   : > { %v747_v19 = vsel %vm736_vm9, %v699_v3, %v662_v43  ;;  %v4333_v30 = vld [vmem:[#allocation2 + $0x10] sm:$0xff]  ;;  %v620_v55 = vpop.permute.xlu1 %619  ;;  %v501_v3 = vrot.slane %v499_v8, 7  ;;  %v537_v43 = vsel %vm4287_vm7, 0, %v4256_v2 }
  0x99   : > { %790 = vst.msk [vmem:[#allocation2 + $0x20] sm:$0xff] %vm785_vm1, %v747_v19  ;;  %3587 = vmatprep.mubr.msk.bf16.mxu0 %vm785_vm1, %v4333_v30  ;;  %v708_v48 = vsel %vm687_vm8, %v530_v41, %v620_v55 }
  0x9a   : > { %v504_v55 = vor.u32 %v502_v38, %v501_v3 }
  0x9b   : > { %v618_v46 = vpop.permute.xlu0 %617 }
  0x9c   : > { %v705_v39 = vsel %vm687_vm8, %v529_v54, %v618_v46  ;;  %v668_v61 = vpop.permute.xlu1 %667 }
  0x9d   : > { %3588 = vmatmul.mubr.msk.bf16.gmra.mrb[4].mxu0 %vm785_vm1, %v4345_v56  ;;  %v756_v1 = vsel %vm736_vm9, %v708_v48, %v668_v61  ;;  %v4365_v10 = vld [vmem:[#allocation2 + $0x28] sm:$0xff]  ;;  %v539_v61 = vsel %vm4287_vm7, 0, %v504_v55 }
  0x9e   : > { %793 = vst.msk [vmem:[#allocation2 + $0x38] sm:$0xff] %vm785_vm1, %v756_v1 }
  0x9f   : > { %v666_v63 = vpop.permute.xlu0 %665 }
  0xa0   : > { %v753_v44 = vsel %vm736_vm9, %v705_v39, %v666_v63  ;;  %v4353_v5 = vld [vmem:[#allocation2 + $0x20] sm:$0xff]  ;;  %v624_v50 = vpop.permute.xlu1 %623 }
  0xa1   : > { %792 = vst.msk [vmem:[#allocation2 + $0x30] sm:$0xff] %vm785_vm1, %v753_v44  ;;  %3591 = vmatprep.mubr.msk.bf16.mxu0 %vm785_vm1, %v4353_v5  ;;  %v714_v9 = vsel %vm687_vm8, %v532_v4, %v624_v50  ;;  %v3983_v50 = vld [vmem:[%s5295_s3] sm:$0xff]  }
  0xa2   : > { %2207 = vmatpush1.bf16.msra.mxu1 %v3983_v50 }
  0xa3   : > { %v622_v49 = vpop.permute.xlu0 %621  ;;  %2208 = vmatprep.subr.bf16.mxu1 %v4045_v0 }
  0xa4   : > { %v711_v11 = vsel %vm687_vm8, %v531_v6, %v622_v49  ;;  %v672_v12 = vpop.permute.xlu1 %671  ;;  %v3984_v49 = vld [vmem:[%s5295_s3 + $0x8] sm:$0xff]  }
  0xa5   : > { %3592 = vmatmul.mubr.msk.bf16.gmra.mrb[8].mxu0 %vm785_vm1, %v4365_v10  ;;  %v762_v15 = vsel %vm736_vm9, %v714_v9, %v672_v12  ;;  %v4385_v23 = vld [vmem:[#allocation2 + $0x38] sm:$0xff]  ;;  %v1422_v9 = vsel %vm882_vm3, %v4320_v37, 0  ;;  %v3987_v37 = vld [vmem:[%s5295_s3 + $0x20] sm:$0xff]   ;;  %v3988_v12 = vld [vmem:[%s5295_s3 + $0x28] sm:$0xff]  }
  0xa6   : > { %795 = vst.msk [vmem:[#allocation2 + $0x48] sm:$0xff] %vm785_vm1, %v762_v15  ;;  %2209 = vmatpush1.bf16.msra.mxu1 %v3984_v49  ;;  %v3992_v15 = vld [vmem:[%s5295_s3 + $0x48] sm:$0xff]  }
  0xa7   : > { %v670_v60 = vpop.permute.xlu0 %669  ;;  %2210 = vmatprep.subr.bf16.mxu1 %v4045_v0 }
  0xa8   : > { %v759_v47 = vsel %vm736_vm9, %v711_v11, %v670_v60  ;;  %v4373_v45 = vld [vmem:[#allocation2 + $0x30] sm:$0xff]  ;;  %v628_v18 = vpop.permute.xlu1 %627 }
  0xa9   : > { %794 = vst.msk [vmem:[#allocation2 + $0x40] sm:$0xff] %vm785_vm1, %v759_v47  ;;  %3595 = vmatprep.mubr.msk.bf16.mxu0 %vm785_vm1, %v4373_v45  ;;  %v720_v22 = vsel %vm687_vm8, %v534_v16, %v628_v18  ;;  %v3985_v11 = vld [vmem:[%s5295_s3 + $0x10] sm:$0xff]   ;;  %v2030_v16 = vld [vmem:[#allocation3 + $0x8] sm:$0xff]  ;;  %v4571_v18 = vld [vmem:[%s5295_s3 + $0xc8] sm:$0xff]  }
  0xaa   : > { %2211 = vmatpush1.bf16.msra.mxu1 %v3985_v11  ;;  %v3993_v47 = vld [vmem:[%s5295_s3 + $0x50] sm:$0xff]   ;;  %3406 = vmatprep.mubr.msk.bf16.mxu1 %vm1921_vm10, %v2030_v16 }
  0xab   : > { %v626_v20 = vpop.permute.xlu0 %625  ;;  %2212 = vmatprep.subr.bf16.mxu1 %v4045_v0 }
  0xac   : > { %v717_v24 = vsel %vm687_vm8, %v533_v17, %v626_v20  ;;  %v676_v26 = vpop.permute.xlu1 %675  ;;  %v4565_v17 = vld [vmem:[%s5295_s3 + $0xc0] sm:$0xff]   ;;  %v4578_v20 = vld [vmem:[%s5295_s3 + $0xd0] sm:$0xff]  }
  0xad   : > { %3596 = vmatmul.mubr.msk.bf16.gmra.mrb[12].mxu0 %vm785_vm1, %v4385_v23  ;;  %v768_v21 = vsel %vm736_vm9, %v720_v22, %v676_v26  ;;  %v4405_v32 = vld [vmem:[#allocation2 + $0x48] sm:$0xff]  ;;  %v4585_v22 = vld [vmem:[%s5295_s3 + $0xd8] sm:$0xff]   ;;  %v4601_v26 = vld [vmem:[#allocation3] sm:$0xff] }
  0xae   : > { %797 = vst.msk [vmem:[#allocation2 + $0x58] sm:$0xff] %vm785_vm1, %v768_v21  ;;  %v4622_v21 = vld [vmem:[%s5295_s3 + $0x100] sm:$0xff]  }
  0xaf   : > { %v674_v27 = vpop.permute.xlu0 %673 }
  0xb0   : > { %v765_v53 = vsel %vm736_vm9, %v717_v24, %v674_v27  ;;  %v4393_v52 = vld [vmem:[#allocation2 + $0x40] sm:$0xff]  ;;  %v632_v35 = vpop.permute.xlu1 %631  ;;  %v4599_v24 = vld [vmem:[%s5295_s3 + $0xe8] sm:$0xff]   ;;  %v4608_v27 = vld [vmem:[%s5295_s3 + $0xf0] sm:$0xff]  }
  0xb1   : > { %796 = vst.msk [vmem:[#allocation2 + $0x50] sm:$0xff] %vm785_vm1, %v765_v53  ;;  %3599 = vmatprep.mubr.msk.bf16.mxu0 %vm785_vm1, %v4393_v52  ;;  %v726_v25 = vsel %vm687_vm8, %v536_v28, %v632_v35  ;;  %v4629_v53 = vld [vmem:[%s5295_s3 + $0x108] sm:$0xff]   ;;  %v4644_v28 = vld [vmem:[%s5295_s3 + $0x118] sm:$0xff]   ;;  %v4005_v35 = vld [vmem:[%s5295_s3 + $0x60] sm:$0xff]  }
  0xb3   : > { %v630_v31 = vpop.permute.xlu0 %629 }
  0xb4   : > { %v723_v33 = vsel %vm687_vm8, %v535_v29, %v630_v31  ;;  %v680_v34 = vpop.permute.xlu1 %679  ;;  %v4650_v29 = vld [vmem:[%s5294_s2] ss:$0 sm:$0xff] }
  0xb5   : > { %3600 = vmatmul.mubr.msk.bf16.gmra.mrb[16].mxu0 %vm785_vm1, %v4405_v32  ;;  %v774_v40 = vsel %vm736_vm9, %v726_v25, %v680_v34  ;;  %v4427_v54 = vld [vmem:[#allocation2 + $0x58] sm:$0xff] }
  0xb6   : > { %799 = vst.msk [vmem:[#allocation2 + $0x68] sm:$0xff] %vm785_vm1, %v774_v40 }
  0xb7   : > { %v678_v36 = vpop.permute.xlu0 %677 }
  0xb8   : > { %v771_v62 = vsel %vm736_vm9, %v723_v33, %v678_v36  ;;  %v4413_v59 = vld [vmem:[#allocation2 + $0x50] sm:$0xff]  ;;  %v636_v51 = vpop.permute.xlu1 %635 }
  0xb9   : > { %798 = vst.msk [vmem:[#allocation2 + $0x60] sm:$0xff] %vm785_vm1, %v771_v62  ;;  %3603 = vmatprep.mubr.msk.bf16.mxu0 %vm785_vm1, %v4413_v59  ;;  %v732_v41 = vsel %vm687_vm8, %v538_v57, %v636_v51  ;;  %v4008_v51 = vld [vmem:[%s5295_s3 + $0x68] sm:$0xff]  }
  0xbb   : > { %v634_v19 = vpop.permute.xlu0 %633 }
  0xbc   : > { %v729_v8 = vsel %vm687_vm8, %v537_v43, %v634_v19  ;;  %v684_v46 = vpop.permute.xlu1 %683 }
  0xbd   : > { %3604 = vmatmul.mubr.msk.bf16.gmra.mrb[20].mxu0 %vm785_vm1, %v4427_v54  ;;  %v780_v48 = vsel %vm736_vm9, %v732_v41, %v684_v46  ;;  %v824_v63 = vld [vmem:[#allocation2 + $0x68] sm:$0xff] }
  0xbe   : > { %801 = vst.msk [vmem:[#allocation2 + $0x78] sm:$0xff] %vm785_vm1, %v780_v48 }
  0xbf   : > { %v682_v7 = vpop.permute.xlu0 %681 }
  0xc0   : > { %v777_v2 = vsel %vm736_vm9, %v729_v8, %v682_v7  ;;  %v4437_v39 = vld [vmem:[#allocation2 + $0x60] sm:$0xff]  ;;  %v686_v58 = vpop.permute.xlu1 %685 }
  0xc1   : > { %800 = vst.msk [vmem:[#allocation2 + $0x70] sm:$0xff] %vm785_vm1, %v777_v2  ;;  %3607 = vmatprep.mubr.msk.bf16.mxu0 %vm785_vm1, %v4437_v39 }
  0xc3   : > { %v638_v38 = vpop.permute.xlu0 %637 }
  0xc4   : > { %v735_v1 = vsel %vm687_vm8, %v539_v61, %v638_v38 }
  0xc5   : > { %3608 = vmatmul.mubr.msk.bf16.gmra.mrb[24].mxu0 %vm785_vm1, %v824_v63  ;;  %v783_v44 = vsel %vm736_vm9, %v735_v1, %v686_v58  ;;  %v826_v6 = vld [vmem:[#allocation2 + $0x78] sm:$0xff] }
  0xc6   : > { %802 = vst.msk [vmem:[#allocation2 + $0x80] sm:$0xff] %vm785_vm1, %v783_v44 }
  0xc8   : > { %v825_v4 = vld [vmem:[#allocation2 + $0x70] sm:$0xff] }
  0xc9   : > { %3611 = vmatprep.mubr.msk.bf16.mxu0 %vm785_vm1, %v825_v4 }
  0xcd   : > { %3612 = vmatmul.mubr.msk.bf16.gmra.mrb[28].mxu0 %vm785_vm1, %v826_v6  ;;  %v1095_v60 = vld [vmem:[#allocation2 + $0x80] sm:$0xff] }
  0xce   : > { %3617 = vmatprep.mubr.msk.bf16.mxu0 %vm785_vm1, %v4323_v42  ;;  %v3986_v42 = vld [vmem:[%s5295_s3 + $0x18] sm:$0xff]  }
  0xcf   : > { %2213 = vmatpush1.bf16.msra.mxu1 %v3986_v42 }
  0xd0   : > { %2214 = vmatprep.subr.bf16.mxu1 %v4045_v0 }
  0xd3   : > { %2215 = vmatpush1.bf16.msra.mxu1 %v3987_v37 }
  0xd4   : > { %2216 = vmatprep.subr.bf16.mxu1 %v4045_v0 }
  0xd5   : > { %3618 = vmatmul.mubr.msk.bf16.vlgmr.msra.gmra.mrb[0].mxu0 %vm785_vm1, %v4333_v30 }
  0xd6   : > { %3650 = vmatpush3.bf16.msra.mxu0 %v1422_v9  ;;  %3621 = vmatprep.mubr.msk.bf16.mxu0 %vm785_vm1, %v4345_v56 }
  0xd7   : > { %2948 = vmatprep.subr.bf16.mxu0 %v4045_v0  ;;  %2217 = vmatpush1.bf16.msra.mxu1 %v3988_v12 }
  0xd8   : > { %2218 = vmatprep.subr.bf16.mxu1 %v4045_v0 }
  0xdd   : > { %3622 = vmatmul.mubr.msk.bf16.gmra.mrb[4].mxu0 %vm785_vm1, %v4353_v5 }
  0xde   : > { %3625 = vmatprep.mubr.msk.bf16.mxu0 %vm785_vm1, %v4365_v10 }
  0xe5   : > { %3626 = vmatmul.mubr.msk.bf16.gmra.mrb[8].mxu0 %vm785_vm1, %v4373_v45 }
  0xe6   : > { %3629 = vmatprep.mubr.msk.bf16.mxu0 %vm785_vm1, %v4385_v23 }
  0xed   : > { %3630 = vmatmul.mubr.msk.bf16.gmra.mrb[12].mxu0 %vm785_vm1, %v4393_v52 }
  0xee   : > { %3633 = vmatprep.mubr.msk.bf16.mxu0 %vm785_vm1, %v4405_v32 }
  0xf5   : > { %3634 = vmatmul.mubr.msk.bf16.gmra.mrb[16].mxu0 %vm785_vm1, %v4413_v59 }
  0xf6   : > { %3637 = vmatprep.mubr.msk.bf16.mxu0 %vm785_vm1, %v4427_v54 }
  0xfd   : > { %3638 = vmatmul.mubr.msk.bf16.gmra.mrb[20].mxu0 %vm785_vm1, %v4437_v39 }
  0xfe   : > { %3641 = vmatprep.mubr.msk.bf16.mxu0 %vm785_vm1, %v824_v63 }
 0x105   : > { %3642 = vmatmul.mubr.msk.bf16.gmra.mrb[24].mxu0 %vm785_vm1, %v825_v4 }
 0x106   : > { %3645 = vmatprep.mubr.msk.bf16.mxu0 %vm785_vm1, %v826_v6 }
 0x10d   : > { %3646 = vmatmul.mubr.msk.bf16.gmra.mrb[28].mxu0 %vm785_vm1, %v1095_v60 }
 0x10e   : > { %3651 = vmatprep.mubr.msk.bf16.mxu0 %vm785_vm1, %v4333_v30  ;;  %v1364_v30 = vld [vmem:[#allocation2 + $0x88] sm:$0xff] }
 0x115   : > { %3652 = vmatmul.mubr.msk.bf16.vlgmr.msra.gmra.mrb[0].mxu0 %vm785_vm1, %v4345_v56  ;;  %v3989_v56 = vld [vmem:[%s5295_s3 + $0x30] sm:$0xff]  }
 0x116   : > { %3655 = vmatprep.mubr.msk.bf16.mxu0 %vm785_vm1, %v4353_v5  ;;  %2219 = vmatpush1.bf16.msra.mxu1 %v3989_v56  ;;  %v3990_v5 = vld [vmem:[%s5295_s3 + $0x38] sm:$0xff]  }
 0x117   : > { %2220 = vmatprep.subr.bf16.mxu1 %v4045_v0  ;;  %2949 = vmatpush1.bf16.msra.mxu0 %v4565_v17 }
 0x118   : > { %2950 = vmatprep.subr.bf16.mxu0 %v4045_v0 }
 0x11a   : > { %2221 = vmatpush1.bf16.msra.mxu1 %v3990_v5 }
 0x11b   : > { %2222 = vmatprep.subr.bf16.mxu1 %v4045_v0  ;;  %2951 = vmatpush1.bf16.msra.mxu0 %v4571_v18 }
 0x11c   : > { %2952 = vmatprep.subr.bf16.mxu0 %v4045_v0 }
 0x11d   : > { %3656 = vmatmul.mubr.msk.bf16.gmra.mrb[4].mxu0 %vm785_vm1, %v4365_v10  ;;  %v3991_v10 = vld [vmem:[%s5295_s3 + $0x40] sm:$0xff]  }
 0x11e   : > { %3659 = vmatprep.mubr.msk.bf16.mxu0 %vm785_vm1, %v4373_v45  ;;  %2223 = vmatpush1.bf16.msra.mxu1 %v3991_v10  ;;  %v3994_v45 = vld [vmem:[%s5295_s3 + $0x58] sm:$0xff]  }
 0x11f   : > { %2224 = vmatprep.subr.bf16.mxu1 %v4045_v0  ;;  %2953 = vmatpush1.bf16.msra.mxu0 %v4578_v20 }
 0x120   : > { %2954 = vmatprep.subr.bf16.mxu0 %v4045_v0 }
 0x122   : > { %2225 = vmatpush1.bf16.msra.mxu1 %v3992_v15 }
 0x123   : > { %2226 = vmatprep.subr.bf16.mxu1 %v4045_v0  ;;  %2955 = vmatpush1.bf16.msra.mxu0 %v4585_v22 }
 0x124   : > { %2956 = vmatprep.subr.bf16.mxu0 %v4045_v0 }
 0x125   : > { %3660 = vmatmul.mubr.msk.bf16.gmra.mrb[8].mxu0 %vm785_vm1, %v4385_v23  ;;  %v4592_v23 = vld [vmem:[%s5295_s3 + $0xe0] sm:$0xff]  }
 0x126   : > { %3663 = vmatprep.mubr.msk.bf16.mxu0 %vm785_vm1, %v4393_v52  ;;  %2227 = vmatpush1.bf16.msra.mxu1 %v3993_v47  ;;  %v4637_v52 = vld [vmem:[%s5295_s3 + $0x110] sm:$0xff]  }
 0x127   : > { %2228 = vmatprep.subr.bf16.mxu1 %v4045_v0  ;;  %2957 = vmatpush1.bf16.msra.mxu0 %v4592_v23 }
 0x128   : > { %2958 = vmatprep.subr.bf16.mxu0 %v4601_v26 }
 0x12a   : > { %2229 = vmatpush1.bf16.msra.mxu1 %v3994_v45 }
 0x12b   : > { %2577 = vmatprep.subr.bf16.mxu1 %v4045_v0  ;;  %2959 = vmatpush1.bf16.msra.mxu0 %v4599_v24 }
 0x12c   : > { %2960 = vmatprep.subr.bf16.mxu0 %v4601_v26 }
 0x12d   : > { %3664 = vmatmul.mubr.msk.bf16.gmra.mrb[12].mxu0 %vm785_vm1, %v4405_v32  ;;  %2239 = vmatmul.mubr.bf16.vlgmr.msra.gmra.mrb[0].mxu1 %v4045_v0  ;;  %v4615_v0 = vld [vmem:[%s5295_s3 + $0xf8] sm:$0xff]  }
 0x12e   : > { %3667 = vmatprep.mubr.msk.bf16.mxu0 %vm785_vm1, %v4413_v59  ;;  %2578 = vmatpush1.bf16.msra.mxu1 %v4005_v35 }
 0x12f   : > { %2961 = vmatpush1.bf16.msra.mxu0 %v4608_v27  ;;  %2579 = vmatprep.subr.bf16.mxu1 %v4601_v26 }
 0x130   : > { %2962 = vmatprep.subr.bf16.mxu0 %v4601_v26 }
 0x132   : > { %2580 = vmatpush1.bf16.msra.mxu1 %v4008_v51 }
 0x133   : > { %2963 = vmatpush1.bf16.msra.mxu0 %v4615_v0  ;;  %2581 = vmatprep.subr.bf16.mxu1 %v4601_v26 }
 0x134   : > { %2964 = vmatprep.subr.bf16.mxu0 %v4601_v26 }
 0x135   : > { %3668 = vmatmul.mubr.msk.bf16.gmra.mrb[16].mxu0 %vm785_vm1, %v4427_v54 }
 0x136   : > { %3671 = vmatprep.mubr.msk.bf16.mxu0 %vm785_vm1, %v4437_v39 }
 0x137   : > { %2965 = vmatpush1.bf16.msra.mxu0 %v4622_v21 }
 0x138   : > { %2966 = vmatprep.subr.bf16.mxu0 %v4601_v26 }
 0x13b   : > { %2967 = vmatpush1.bf16.msra.mxu0 %v4629_v53 }
 0x13c   : > { %2968 = vmatprep.subr.bf16.mxu0 %v4601_v26 }
 0x13d   : > { %3672 = vmatmul.mubr.msk.bf16.gmra.mrb[20].mxu0 %vm785_vm1, %v824_v63 }
 0x13e   : > { %3675 = vmatprep.mubr.msk.bf16.mxu0 %vm785_vm1, %v825_v4 }
 0x13f   : > { %2969 = vmatpush1.bf16.msra.mxu0 %v4637_v52 }
 0x140   : > { %2970 = vmatprep.subr.bf16.mxu0 %v4601_v26 }
 0x143   : > { %2971 = vmatpush1.bf16.msra.mxu0 %v4644_v28 }
 0x145   : > { %3676 = vmatmul.mubr.msk.bf16.gmra.mrb[24].mxu0 %vm785_vm1, %v826_v6 }
 0x146   : > { %3679 = vmatprep.mubr.msk.bf16.mxu0 %vm785_vm1, %v1095_v60 }
 0x14d   : > { %3680 = vmatmul.mubr.msk.bf16.gmra.mrb[28].mxu0 %vm785_vm1, %v1364_v30 }
 0x1e8   : > { %v3653_v31 = vpop.f32.mrb[0].mxu0 }
 0x1e9   : > { %v3707_v25 = vadd.f32 %v3653_v31, %v4650_v29  ;;  %v1458_v32 = vpop.f32.mrb[1].mxu0 }
 0x1ea   : > { %v3708_v33 = vadd.f32 %v4650_v29, %v1458_v32  ;;  %v3654_v34 = vpop.f32.mrb[2].mxu0 }
 0x1eb   : > { %v3709_v36 = vadd.f32 %v3654_v34, %v4650_v29  ;;  %v1461_v40 = vpop.f32.mrb[3].mxu0  ;;  %v1619_v59 = vmax.f32 %v3707_v25, 0.0 }
 0x1ec   : > { %v3710_v62 = vadd.f32 %v4650_v29, %v1461_v40  ;;  %v1617_v57 = vmax.f32 %v3708_v33, 0.0 }
 0x1ed   : > { %v1620_v3 = vmax.f32 %v3709_v36, 0.0 }
 0x1ee   : > { %v1618_v43 = vmax.f32 %v3710_v62, 0.0 }
 0x1ef   : > { %v1650_v19 = vpack.c.bf16 %v1620_v3, %v1619_v59 }
 0x1f0   : > { %v1649_v41 = vpack.c.bf16 %v1618_v43, %v1617_v57  ;;  %v3657_v54 = vpop.f32.mrb[4].mxu0 }
 0x1f1   : > { %v1673_v8 = vshrl.u32 %v1650_v19, 16  ;;  %v1676_v55 = vshll.u32 %v1650_v19, 16  ;;  %v3711_v46 = vadd.f32 %v3657_v54, %v4650_v29  ;;  %1891 = vrot.lane.b32.xlu1 %v1650_v19, %s4048_s25  ;;  %v1474_v7 = vpop.f32.mrb[5].mxu0  ;;  %v4009_v54 = vld [vmem:[%s5295_s3 + $0x70] sm:$0xff]  }
 0x1f2   : > { %v1666_v48 = vshrl.u32 %v1649_v41, 16  ;;  %v1669_v2 = vshll.u32 %v1649_v41, 16  ;;  %v3712_v39 = vadd.f32 %v4650_v29, %v1474_v7  ;;  %1889 = vrot.lane.b32.xlu0 %v1649_v41, %s4048_s25  ;;  %v3658_v61 = vpop.f32.mrb[6].mxu0  ;;  %2582 = vmatpush1.bf16.msra.mxu1 %v4009_v54 }
 0x1f3   : > { %v1811_v58 = vrot.slane %v1676_v55, 1  ;;  %v3713_v38 = vadd.f32 %v3658_v61, %v4650_v29  ;;  %v1477_v63 = vpop.f32.mrb[7].mxu0  ;;  %v1675_v1 = vrot.slane %v1673_v8, 7  ;;  %v1623_v49 = vmax.f32 %v3711_v46, 0.0  ;;  %2583 = vmatprep.subr.bf16.mxu1 %v4601_v26 }
 0x1f4   : > { %v1809_v44 = vrot.slane %v1669_v2, 1  ;;  %v3714_v4 = vadd.f32 %v4650_v29, %v1477_v63  ;;  %v1668_v6 = vrot.slane %v1666_v48, 7  ;;  %v1621_v37 = vmax.f32 %v3712_v39, 0.0 }
 0x1f5   : > { %v1812_v50 = vor.u32 %v1811_v58, %v1673_v8  ;;  %v1624_v9 = vmax.f32 %v3713_v38, 0.0  ;;  %v4670_v11 = vor.u32 %v1676_v55, %v1675_v1 }
 0x1f6   : > { %v1810_v42 = vor.u32 %v1809_v44, %v1666_v48  ;;  %v1622_v12 = vmax.f32 %v3714_v4, 0.0  ;;  %v4672_v60 = vor.u32 %v1669_v2, %v1668_v6 }
 0x1f7   : > { %v1858_v30 = vsel %vm4124_vm4, %v1812_v50, 0  ;;  %v1652_v56 = vpack.c.bf16 %v1624_v9, %v1623_v49 }
 0x1f8   : > { %1991 = vst.msk [vmem:[#allocation3 + $0x28] sm:$0xff] %vm1921_vm10, %v1858_v30  ;;  %v1857_v5 = vsel %vm4124_vm4, %v1810_v42, 0  ;;  %v1651_v10 = vpack.c.bf16 %v1622_v12, %v1621_v37  ;;  %v3661_v15 = vpop.f32.mrb[8].mxu0 }
 0x1f9   : > { %1989 = vst.msk [vmem:[#allocation3 + $0x18] sm:$0xff] %vm1921_vm10, %v1857_v5  ;;  %v1687_v47 = vshrl.u32 %v1652_v56, 16  ;;  %v1690_v45 = vshll.u32 %v1652_v56, 16  ;;  %v3715_v16 = vadd.f32 %v3661_v15, %v4650_v29  ;;  %1895 = vrot.lane.b32.xlu1 %v1652_v56, %s4048_s25  ;;  %v1490_v35 = vpop.f32.mrb[9].mxu0 }
 0x1fa   : > { %v1680_v31 = vshrl.u32 %v1651_v10, 16  ;;  %v1683_v25 = vshll.u32 %v1651_v10, 16  ;;  %v3716_v32 = vadd.f32 %v4650_v29, %v1490_v35  ;;  %1893 = vrot.lane.b32.xlu0 %v1651_v10, %s4048_s25  ;;  %v3662_v33 = vpop.f32.mrb[10].mxu0 }
 0x1fb   : > { %v1815_v34 = vrot.slane %v1690_v45, 1  ;;  %v3717_v36 = vadd.f32 %v3662_v33, %v4650_v29  ;;  %v1493_v40 = vpop.f32.mrb[11].mxu0  ;;  %v1689_v62 = vrot.slane %v1687_v47, 7  ;;  %v1627_v51 = vmax.f32 %v3715_v16, 0.0 }
 0x1fc   : > { %v1813_v59 = vrot.slane %v1683_v25, 1  ;;  %v3718_v3 = vadd.f32 %v4650_v29, %v1493_v40  ;;  %v1682_v57 = vrot.slane %v1680_v31, 7  ;;  %v1625_v55 = vmax.f32 %v3716_v32, 0.0 }
 0x1fd   : > { %v1816_v43 = vor.u32 %v1815_v34, %v1687_v47  ;;  %v1628_v19 = vmax.f32 %v3717_v36, 0.0  ;;  %v4686_v41 = vor.u32 %v1690_v45, %v1689_v62  ;;  %v4010_v34 = vld [vmem:[%s5295_s3 + $0x78] sm:$0xff]  }
 0x1fe   : > { %v1814_v8 = vor.u32 %v1813_v59, %v1680_v31  ;;  %v1626_v46 = vmax.f32 %v3718_v3, 0.0  ;;  %v4691_v7 = vor.u32 %v1683_v25, %v1682_v57  ;;  %2584 = vmatpush1.bf16.msra.mxu1 %v4010_v34 }
 0x1ff   : > { %v1860_v48 = vsel %vm4124_vm4, %v1816_v43, 0  ;;  %v1654_v2 = vpack.c.bf16 %v1628_v19, %v1627_v51  ;;  %v4695_v39 = vld [vmem:[#allocation3 + $0x28] sm:$0xff]  ;;  %2585 = vmatprep.subr.bf16.mxu1 %v4601_v26 }
 0x200   : > { %1995 = vst.msk [vmem:[#allocation3 + $0x48] sm:$0xff] %vm1921_vm10, %v1860_v48  ;;  %v1859_v61 = vsel %vm4124_vm4, %v1814_v8, 0  ;;  %v1653_v58 = vpack.c.bf16 %v1626_v46, %v1625_v55  ;;  %v3665_v38 = vpop.f32.mrb[12].mxu0  ;;  %3510 = vmatprep.mubr.msk.bf16.mxu0 %vm1921_vm10, %v4695_v39  ;;  %v4702_v63 = vld [vmem:[#allocation3 + $0x18] sm:$0xff] }
 0x201   : > { %1993 = vst.msk [vmem:[#allocation3 + $0x38] sm:$0xff] %vm1921_vm10, %v1859_v61  ;;  %v1701_v1 = vshrl.u32 %v1654_v2, 16  ;;  %v1704_v44 = vshll.u32 %v1654_v2, 16  ;;  %v3719_v4 = vadd.f32 %v3665_v38, %v4650_v29  ;;  %3407 = vmatprep.mubr.msk.bf16.mxu1 %vm1921_vm10, %v4702_v63  ;;  %1899 = vrot.lane.b32.xlu1 %v1654_v2, %s4048_s25  ;;  %v1506_v6 = vpop.f32.mrb[13].mxu0 }
 0x202   : > { %v1694_v50 = vshrl.u32 %v1653_v58, 16  ;;  %v1697_v49 = vshll.u32 %v1653_v58, 16  ;;  %v3720_v9 = vadd.f32 %v4650_v29, %v1506_v6  ;;  %1897 = vrot.lane.b32.xlu0 %v1653_v58, %s4048_s25  ;;  %v3666_v42 = vpop.f32.mrb[14].mxu0 }
 0x203   : > { %v1819_v37 = vrot.slane %v1704_v44, 1  ;;  %v3721_v12 = vadd.f32 %v3666_v42, %v4650_v29  ;;  %v1509_v30 = vpop.f32.mrb[15].mxu0  ;;  %v1703_v56 = vrot.slane %v1701_v1, 7  ;;  %v1631_v45 = vmax.f32 %v3719_v4, 0.0 }
 0x204   : > { %v1817_v5 = vrot.slane %v1697_v49, 1  ;;  %v3722_v10 = vadd.f32 %v4650_v29, %v1509_v30  ;;  %v1696_v15 = vrot.slane %v1694_v50, 7  ;;  %v1629_v25 = vmax.f32 %v3720_v9, 0.0  ;;  %v4011_v30 = vld [vmem:[%s5295_s3 + $0x80] sm:$0xff]  }
 0x205   : > { %v1820_v47 = vor.u32 %v1819_v37, %v1701_v1  ;;  %v1632_v16 = vmax.f32 %v3721_v12, 0.0  ;;  %v4714_v35 = vor.u32 %v1704_v44, %v1703_v56  ;;  %2586 = vmatpush1.bf16.msra.mxu1 %v4011_v30 }
 0x206   : > { %v1818_v31 = vor.u32 %v1817_v5, %v1694_v50  ;;  %v1630_v32 = vmax.f32 %v3722_v10, 0.0  ;;  %v4716_v33 = vor.u32 %v1697_v49, %v1696_v15  ;;  %2587 = vmatprep.subr.bf16.mxu1 %v4601_v26 }
 0x207   : > { %v1862_v36 = vsel %vm4124_vm4, %v1820_v47, 0  ;;  %v1656_v40 = vpack.c.bf16 %v1632_v16, %v1631_v45 }
 0x208   : > { %1999 = vst.msk [vmem:[#allocation3 + $0x68] sm:$0xff] %vm1921_vm10, %v1862_v36  ;;  %v1861_v62 = vsel %vm4124_vm4, %v1818_v31, 0  ;;  %v1655_v59 = vpack.c.bf16 %v1630_v32, %v1629_v25  ;;  %v3669_v3 = vpop.f32.mrb[16].mxu0 }
 0x209   : > { %1997 = vst.msk [vmem:[#allocation3 + $0x58] sm:$0xff] %vm1921_vm10, %v1861_v62  ;;  %v1715_v57 = vshrl.u32 %v1656_v40, 16  ;;  %v1718_v43 = vshll.u32 %v1656_v40, 16  ;;  %v3723_v51 = vadd.f32 %v3669_v3, %v4650_v29  ;;  %1903 = vrot.lane.b32.xlu1 %v1656_v40, %s4048_s25  ;;  %v1522_v19 = vpop.f32.mrb[17].mxu0 }
 0x20a   : > { %v1708_v54 = vshrl.u32 %v1655_v59, 16  ;;  %v1711_v8 = vshll.u32 %v1655_v59, 16  ;;  %v3724_v55 = vadd.f32 %v4650_v29, %v1522_v19  ;;  %1901 = vrot.lane.b32.xlu0 %v1655_v59, %s4048_s25  ;;  %v3670_v46 = vpop.f32.mrb[18].mxu0 }
 0x20b   : > { %v1823_v48 = vrot.slane %v1718_v43, 1  ;;  %v3725_v2 = vadd.f32 %v3670_v46, %v4650_v29  ;;  %v1525_v61 = vpop.f32.mrb[19].mxu0  ;;  %v1717_v58 = vrot.slane %v1715_v57, 7  ;;  %v1635_v6 = vmax.f32 %v3723_v51, 0.0 }
 0x20c   : > { %v1821_v38 = vrot.slane %v1711_v8, 1  ;;  %v3726_v1 = vadd.f32 %v4650_v29, %v1525_v61  ;;  %v1710_v44 = vrot.slane %v1708_v54, 7  ;;  %v1633_v42 = vmax.f32 %v3724_v55, 0.0 }
 0x20d   : > { %v1824_v4 = vor.u32 %v1823_v48, %v1715_v57  ;;  %v1636_v50 = vmax.f32 %v3725_v2, 0.0  ;;  %v4734_v49 = vor.u32 %v1718_v43, %v1717_v58 }
 0x20e   : > { %v1822_v9 = vor.u32 %v1821_v38, %v1708_v54  ;;  %v1634_v37 = vmax.f32 %v3726_v1, 0.0  ;;  %v4736_v12 = vor.u32 %v1711_v8, %v1710_v44 }
 0x20f   : > { %v1864_v56 = vsel %vm4124_vm4, %v1824_v4, 0  ;;  %v1658_v5 = vpack.c.bf16 %v1636_v50, %v1635_v6 }
 0x210   : > { %2003 = vst.msk [vmem:[#allocation3 + $0x88] sm:$0xff] %vm1921_vm10, %v1864_v56  ;;  %v1863_v10 = vsel %vm4124_vm4, %v1822_v9, 0  ;;  %v1657_v15 = vpack.c.bf16 %v1634_v37, %v1633_v42  ;;  %v3673_v47 = vpop.f32.mrb[20].mxu0 }
 0x211   : > { %2001 = vst.msk [vmem:[#allocation3 + $0x78] sm:$0xff] %vm1921_vm10, %v1863_v10  ;;  %v1729_v45 = vshrl.u32 %v1658_v5, 16  ;;  %v1732_v16 = vshll.u32 %v1658_v5, 16  ;;  %v3727_v31 = vadd.f32 %v3673_v47, %v4650_v29  ;;  %1907 = vrot.lane.b32.xlu1 %v1658_v5, %s4048_s25  ;;  %v1538_v25 = vpop.f32.mrb[21].mxu0 }
 0x212   : > { %v1722_v32 = vshrl.u32 %v1657_v15, 16  ;;  %v1725_v34 = vshll.u32 %v1657_v15, 16  ;;  %v3728_v36 = vadd.f32 %v4650_v29, %v1538_v25  ;;  %1905 = vrot.lane.b32.xlu0 %v1657_v15, %s4048_s25  ;;  %v3674_v40 = vpop.f32.mrb[22].mxu0 }
 0x213   : > { %v1827_v62 = vrot.slane %v1732_v16, 1  ;;  %v3729_v59 = vadd.f32 %v3674_v40, %v4650_v29  ;;  %v1541_v3 = vpop.f32.mrb[23].mxu0  ;;  %v1731_v57 = vrot.slane %v1729_v45, 7  ;;  %v1639_v8 = vmax.f32 %v3727_v31, 0.0 }
 0x214   : > { %v1825_v43 = vrot.slane %v1725_v34, 1  ;;  %v3730_v51 = vadd.f32 %v4650_v29, %v1541_v3  ;;  %v1724_v19 = vrot.slane %v1722_v32, 7  ;;  %v1637_v2 = vmax.f32 %v3728_v36, 0.0 }
 0x215   : > { %v1828_v54 = vor.u32 %v1827_v62, %v1729_v45  ;;  %v1640_v55 = vmax.f32 %v3729_v59, 0.0  ;;  %v4754_v46 = vor.u32 %v1732_v16, %v1731_v57  ;;  %v4012_v59 = vld [vmem:[%s5295_s3 + $0x88] sm:$0xff]  }
 0x216   : > { %v1826_v48 = vor.u32 %v1825_v43, %v1722_v32  ;;  %v1638_v61 = vmax.f32 %v3730_v51, 0.0  ;;  %v4756_v58 = vor.u32 %v1725_v34, %v1724_v19  ;;  %2588 = vmatpush1.bf16.msra.mxu1 %v4012_v59 }
 0x217   : > { %v1866_v38 = vsel %vm4124_vm4, %v1828_v54, 0  ;;  %v1660_v1 = vpack.c.bf16 %v1640_v55, %v1639_v8  ;;  %v4013_v8 = vld [vmem:[%s5295_s3 + $0x90] sm:$0xff]   ;;  %2589 = vmatprep.subr.bf16.mxu1 %v4601_v26 }
 0x218   : > { %2007 = vst.msk [vmem:[#allocation3 + $0xa8] sm:$0xff] %vm1921_vm10, %v1866_v38  ;;  %v1865_v44 = vsel %vm4124_vm4, %v1826_v48, 0  ;;  %v1659_v4 = vpack.c.bf16 %v1638_v61, %v1637_v2  ;;  %v3677_v6 = vpop.f32.mrb[24].mxu0 }
 0x219   : > { %2005 = vst.msk [vmem:[#allocation3 + $0x98] sm:$0xff] %vm1921_vm10, %v1865_v44  ;;  %v1743_v50 = vshrl.u32 %v1660_v1, 16  ;;  %v1746_v9 = vshll.u32 %v1660_v1, 16  ;;  %v3731_v42 = vadd.f32 %v3677_v6, %v4650_v29  ;;  %1911 = vrot.lane.b32.xlu1 %v1660_v1, %s4048_s25  ;;  %v1554_v37 = vpop.f32.mrb[25].mxu0 }
 0x21a   : > { %v1736_v30 = vshrl.u32 %v1659_v4, 16  ;;  %v1739_v56 = vshll.u32 %v1659_v4, 16  ;;  %v3732_v5 = vadd.f32 %v4650_v29, %v1554_v37  ;;  %1909 = vrot.lane.b32.xlu0 %v1659_v4, %s4048_s25  ;;  %v3678_v10 = vpop.f32.mrb[26].mxu0  ;;  %2590 = vmatpush1.bf16.msra.mxu1 %v4013_v8 }
 0x21b   : > { %v1831_v15 = vrot.slane %v1746_v9, 1  ;;  %v3733_v47 = vadd.f32 %v3678_v10, %v4650_v29  ;;  %v1557_v45 = vpop.f32.mrb[27].mxu0  ;;  %v1745_v16 = vrot.slane %v1743_v50, 7  ;;  %v1643_v36 = vmax.f32 %v3731_v42, 0.0  ;;  %2591 = vmatprep.subr.bf16.mxu1 %v4601_v26 }
 0x21c   : > { %v1829_v31 = vrot.slane %v1739_v56, 1  ;;  %v3734_v25 = vadd.f32 %v4650_v29, %v1557_v45  ;;  %v1738_v32 = vrot.slane %v1736_v30, 7  ;;  %v1641_v57 = vmax.f32 %v3732_v5, 0.0 }
 0x21d   : > { %v1832_v34 = vor.u32 %v1831_v15, %v1743_v50  ;;  %v1644_v40 = vmax.f32 %v3733_v47, 0.0  ;;  %v4770_v62 = vor.u32 %v1746_v9, %v1745_v16 }
 0x21e   : > { %v1830_v3 = vor.u32 %v1829_v31, %v1736_v30  ;;  %v1642_v43 = vmax.f32 %v3734_v25, 0.0  ;;  %v4775_v51 = vor.u32 %v1739_v56, %v1738_v32 }
 0x21f   : > { %v1868_v19 = vsel %vm4124_vm4, %v1832_v34, 0  ;;  %v1662_v54 = vpack.c.bf16 %v1644_v40, %v1643_v36 }
 0x220   : > { %2011 = vst.msk [vmem:[#allocation3 + $0xc8] sm:$0xff] %vm1921_vm10, %v1868_v19  ;;  %v1867_v55 = vsel %vm4124_vm4, %v1830_v3, 0  ;;  %v1661_v48 = vpack.c.bf16 %v1642_v43, %v1641_v57  ;;  %v3681_v2 = vpop.f32.mrb[28].mxu0 }
 0x221   : > { %2009 = vst.msk [vmem:[#allocation3 + $0xb8] sm:$0xff] %vm1921_vm10, %v1867_v55  ;;  %v1757_v61 = vshrl.u32 %v1662_v54, 16  ;;  %v1760_v38 = vshll.u32 %v1662_v54, 16  ;;  %v3735_v1 = vadd.f32 %v3681_v2, %v4650_v29  ;;  %1915 = vrot.lane.b32.xlu1 %v1662_v54, %s4048_s25  ;;  %v1570_v44 = vpop.f32.mrb[29].mxu0 }
 0x222   : > { %v1750_v4 = vshrl.u32 %v1661_v48, 16  ;;  %v1753_v6 = vshll.u32 %v1661_v48, 16  ;;  %v3736_v50 = vadd.f32 %v4650_v29, %v1570_v44  ;;  %1913 = vrot.lane.b32.xlu0 %v1661_v48, %s4048_s25  ;;  %v3682_v9 = vpop.f32.mrb[30].mxu0 }
 0x223   : > { %v1835_v42 = vrot.slane %v1760_v38, 1  ;;  %v3737_v37 = vadd.f32 %v3682_v9, %v4650_v29  ;;  %v1573_v30 = vpop.f32.mrb[31].mxu0  ;;  %v1759_v56 = vrot.slane %v1757_v61, 7  ;;  %v1647_v45 = vmax.f32 %v3735_v1, 0.0 }
 0x224   : > { %v1833_v5 = vrot.slane %v1753_v6, 1  ;;  %v3738_v10 = vadd.f32 %v4650_v29, %v1573_v30  ;;  %v1752_v15 = vrot.slane %v1750_v4, 7  ;;  %v1645_v32 = vmax.f32 %v3736_v50, 0.0  ;;  %v4014_v29 = vld [vmem:[%s5295_s3 + $0x98] sm:$0xff]   ;;  %v4015_v50 = vld [vmem:[%s5295_s3 + $0xa0] sm:$0xff]  }
 0x225   : > { %v1836_v47 = vor.u32 %v1835_v42, %v1757_v61  ;;  %v1648_v16 = vmax.f32 %v3737_v37, 0.0  ;;  %v4794_v31 = vor.u32 %v1760_v38, %v1759_v56  ;;  %2592 = vmatpush1.bf16.msra.mxu1 %v4014_v29  ;;  %v4016_v42 = vld [vmem:[%s5295_s3 + $0xa8] sm:$0xff]   ;;  %v4017_v37 = vld [vmem:[%s5295_s3 + $0xb0] sm:$0xff]   ;;  %v1794_v56 = vsel %vm4287_vm7, 0, %v4670_v11 }
 0x226   : > { %v1834_v25 = vor.u32 %v1833_v5, %v1750_v4  ;;  %v1646_v34 = vmax.f32 %v3738_v10, 0.0  ;;  %v4796_v36 = vor.u32 %v1753_v6, %v1752_v15  ;;  %2593 = vmatprep.subr.bf16.mxu1 %v4601_v26  ;;  %v1793_v15 = vsel %vm4287_vm7, 0, %v4672_v60 }
 0x227   : > { %v1870_v40 = vsel %vm4124_vm4, %v1836_v47, 0  ;;  %v1664_v59 = vpack.c.bf16 %v1648_v16, %v1647_v45  ;;  %v4849_v45 = vld [vmem:[#allocation3 + $0x38] sm:$0xff]  ;;  %v1796_v60 = vsel %vm4287_vm7, 0, %v4686_v41 }
 0x228   : > { %2015 = vst.msk [vmem:[#allocation3 + $0xe8] sm:$0xff] %vm1921_vm10, %v1870_v40  ;;  %v1869_v3 = vsel %vm4124_vm4, %v1834_v25, 0  ;;  %v1663_v57 = vpack.c.bf16 %v1646_v34, %v1645_v32  ;;  %v1795_v32 = vsel %vm4287_vm7, 0, %v4691_v7  ;;  %v4870_v40 = vld [vmem:[#allocation3 + $0x48] sm:$0xff]  ;;  %v1798_v7 = vsel %vm4287_vm7, 0, %v4714_v35  ;;  %v4998_v14 = vld [vmem:[#allocation3 + $0xb8] sm:$0xff] }
 0x229   : > { %2013 = vst.msk [vmem:[#allocation3 + $0xd8] sm:$0xff] %vm1921_vm10, %v1869_v3  ;;  %v1771_v43 = vshrl.u32 %v1664_v59, 16  ;;  %v1774_v19 = vshll.u32 %v1664_v59, 16  ;;  %1919 = vrot.lane.b32.xlu1 %v1664_v59, %s4048_s25  ;;  %2594 = vmatpush1.bf16.msra.mxu1 %v4015_v50  ;;  %v1797_v3 = vsel %vm4287_vm7, 0, %v4716_v33  ;;  %v1800_v33 = vsel %vm4287_vm7, 0, %v4734_v49 }
 0x22a   : > { %v1764_v54 = vshrl.u32 %v1663_v57, 16  ;;  %v1767_v8 = vshll.u32 %v1663_v57, 16  ;;  %1917 = vrot.lane.b32.xlu0 %v1663_v57, %s4048_s25  ;;  %2595 = vmatprep.subr.bf16.mxu1 %v4601_v26 }
 0x22b   : > { %v1839_v55 = vrot.slane %v1774_v19, 1  ;;  %v1773_v48 = vrot.slane %v1771_v43, 7 }
 0x22c   : > { %v1837_v2 = vrot.slane %v1767_v8, 1  ;;  %v1766_v61 = vrot.slane %v1764_v54, 7 }
 0x22d   : > { %v1840_v38 = vor.u32 %v1839_v55, %v1771_v43  ;;  %v4810_v1 = vor.u32 %v1774_v19, %v1773_v48  ;;  %2596 = vmatpush1.bf16.msra.mxu1 %v4016_v42  ;;  %v4890_v43 = vld [vmem:[#allocation3 + $0x58] sm:$0xff]  ;;  %v4910_v48 = vld [vmem:[#allocation3 + $0x68] sm:$0xff]  ;;  %v1803_v42 = vsel %vm4287_vm7, 0, %v4775_v51  ;;  %v1806_v51 = vsel %vm4287_vm7, 0, %v4794_v31 }
 0x22e   : > { %v1838_v44 = vor.u32 %v1837_v2, %v1764_v54  ;;  %v4812_v4 = vor.u32 %v1767_v8, %v1766_v61  ;;  %2597 = vmatprep.subr.bf16.mxu1 %v4601_v26  ;;  %v1799_v8 = vsel %vm4287_vm7, 0, %v4736_v12  ;;  %v1802_v12 = vsel %vm4287_vm7, 0, %v4754_v46 }
 0x22f   : > { %v1872_v6 = vsel %vm4124_vm4, %v1840_v38, 0  ;;  %v1801_v38 = vsel %vm4287_vm7, 0, %v4756_v58  ;;  %v1804_v58 = vsel %vm4287_vm7, 0, %v4770_v62 }
 0x230   : > { %2019 = vst.msk [vmem:[#allocation3 + $0x108] sm:$0xff] %vm1921_vm10, %v1872_v6  ;;  %v1871_v9 = vsel %vm4124_vm4, %v1838_v44, 0  ;;  %v4930_v6 = vld [vmem:[#allocation3 + $0x78] sm:$0xff] }
 0x231   : > { %2017 = vst.msk [vmem:[#allocation3 + $0xf8] sm:$0xff] %vm1921_vm10, %v1871_v9  ;;  %2598 = vmatpush1.bf16.msra.mxu1 %v4017_v37 }
 0x232   : > { %2599 = vmatprep.subr.bf16.mxu1 %v4601_v26 }
 0x235   : > { %2600 = vmatpush1.bf16.msra.mxu1 %v4018_v13  ;;  %v4950_v13 = vld [vmem:[#allocation3 + $0x88] sm:$0xff] }
 0x236   : > { %3683 = vmatprep.subr.bf16.mxu1 %v4601_v26 }
 0x263   : > { %v1892_v30 = vpop.permute.xlu1 %1891 }
 0x264   : > { %v4840_v5 = vsel %vm1921_vm10, %v1794_v56, %v1892_v30  ;;  %v1890_v10 = vpop.permute.xlu0 %1889 }
 0x265   : > { %v4846_v47 = vsel %vm1921_vm10, %v1793_v15, %v1890_v10  ;;  %2981 = vmatmul.mubr.bf16.vlgmr.msra.gmra.mrb[32].mxu0 %v4840_v5  ;;  %v1805_v10 = vsel %vm4287_vm7, 0, %v4796_v36  ;;  %v1808_v36 = vsel %vm4287_vm7, 0, %v4810_v1  ;;  %v5006_v1 = vld [vmem:[#allocation3 + $0xc8] sm:$0xff] }
 0x266   : > { %2247 = vmatmul.mubr.bf16.gmra.mrb[4].mxu1 %v4846_v47  ;;  %3511 = vmatprep.mubr.msk.bf16.mxu0 %vm1921_vm10, %v4849_v45 }
 0x267   : > { %3408 = vmatprep.mubr.msk.bf16.mxu1 %vm1921_vm10, %v4695_v39 }
 0x26b   : > { %v1896_v11 = vpop.permute.xlu1 %1895 }
 0x26c   : > { %v4860_v16 = vsel %vm1921_vm10, %v1796_v60, %v1896_v11  ;;  %v1894_v25 = vpop.permute.xlu0 %1893  ;;  %v4970_v11 = vld [vmem:[#allocation3 + $0x98] sm:$0xff] }
 0x26d   : > { %v4866_v34 = vsel %vm1921_vm10, %v1795_v32, %v1894_v25  ;;  %v1807_v32 = vsel %vm4287_vm7, 0, %v4812_v4  ;;  %v5014_v4 = vld [vmem:[#allocation3 + $0xd8] sm:$0xff] }
 0x26e   : > { %2255 = vmatmul.mubr.bf16.gmra.mrb[8].mxu1 %v4840_v5  ;;  %2989 = vmatmul.mubr.bf16.gmra.mrb[36].mxu0 %v4866_v34 }
 0x26f   : > { %3409 = vmatprep.mubr.msk.bf16.mxu1 %vm1921_vm10, %v4849_v45  ;;  %3512 = vmatprep.mubr.msk.bf16.mxu0 %vm1921_vm10, %v4870_v40 }
 0x273   : > { %v1900_v41 = vpop.permute.xlu1 %1899 }
 0x274   : > { %v4880_v59 = vsel %vm1921_vm10, %v1798_v7, %v1900_v41  ;;  %v1898_v29 = vpop.permute.xlu0 %1897  ;;  %v4990_v7 = vld [vmem:[#allocation3 + $0xa8] sm:$0xff] }
 0x275   : > { %v4886_v57 = vsel %vm1921_vm10, %v1797_v3, %v1898_v29  ;;  %v5022_v29 = vld [vmem:[#allocation3 + $0xe8] sm:$0xff]  ;;  %v5030_v3 = vld [vmem:[#allocation3 + $0xf8] sm:$0xff] }
 0x276   : > { %2263 = vmatmul.mubr.bf16.gmra.mrb[12].mxu1 %v4866_v34  ;;  %2997 = vmatmul.mubr.bf16.gmra.mrb[40].mxu0 %v4860_v16 }
 0x277   : > { %3410 = vmatprep.mubr.msk.bf16.mxu1 %vm1921_vm10, %v4870_v40  ;;  %3513 = vmatprep.mubr.msk.bf16.mxu0 %vm1921_vm10, %v4890_v43 }
 0x27b   : > { %v1904_v35 = vpop.permute.xlu1 %1903 }
 0x27c   : > { %v4900_v19 = vsel %vm1921_vm10, %v1800_v33, %v1904_v35  ;;  %v1902_v54 = vpop.permute.xlu0 %1901  ;;  %v5038_v35 = vld [vmem:[#allocation3 + $0x108] sm:$0xff] }
 0x27d   : > { %v4906_v55 = vsel %vm1921_vm10, %v1799_v8, %v1902_v54 }
 0x27e   : > { %2271 = vmatmul.mubr.bf16.gmra.mrb[16].mxu1 %v4860_v16  ;;  %3005 = vmatmul.mubr.bf16.gmra.mrb[44].mxu0 %v4886_v57 }
 0x27f   : > { %3411 = vmatprep.mubr.msk.bf16.mxu1 %vm1921_vm10, %v4890_v43  ;;  %3514 = vmatprep.mubr.msk.bf16.mxu0 %vm1921_vm10, %v4910_v48 }
 0x283   : > { %v1908_v49 = vpop.permute.xlu1 %1907 }
 0x284   : > { %v4920_v2 = vsel %vm1921_vm10, %v1802_v12, %v1908_v49  ;;  %v1906_v61 = vpop.permute.xlu0 %1905 }
 0x285   : > { %v4926_v44 = vsel %vm1921_vm10, %v1801_v38, %v1906_v61 }
 0x286   : > { %2279 = vmatmul.mubr.bf16.gmra.mrb[20].mxu1 %v4886_v57  ;;  %3013 = vmatmul.mubr.bf16.gmra.mrb[48].mxu0 %v4880_v59 }
 0x287   : > { %3412 = vmatprep.mubr.msk.bf16.mxu1 %vm1921_vm10, %v4910_v48  ;;  %3515 = vmatprep.mubr.msk.bf16.mxu0 %vm1921_vm10, %v4930_v6 }
 0x28b   : > { %v1912_v46 = vpop.permute.xlu1 %1911 }
 0x28c   : > { %v4940_v50 = vsel %vm1921_vm10, %v1804_v58, %v1912_v46  ;;  %v1910_v9 = vpop.permute.xlu0 %1909 }
 0x28d   : > { %v4946_v37 = vsel %vm1921_vm10, %v1803_v42, %v1910_v9 }
 0x28e   : > { %2287 = vmatmul.mubr.bf16.gmra.mrb[24].mxu1 %v4880_v59  ;;  %3021 = vmatmul.mubr.bf16.gmra.mrb[52].mxu0 %v4906_v55 }
 0x28f   : > { %3413 = vmatprep.mubr.msk.bf16.mxu1 %vm1921_vm10, %v4930_v6  ;;  %3516 = vmatprep.mubr.msk.bf16.mxu0 %vm1921_vm10, %v4950_v13 }
 0x293   : > { %v1916_v62 = vpop.permute.xlu1 %1915 }
 0x294   : > { %v4960_v30 = vsel %vm1921_vm10, %v1806_v51, %v1916_v62  ;;  %v1914_v56 = vpop.permute.xlu0 %1913 }
 0x295   : > { %v4966_v15 = vsel %vm1921_vm10, %v1805_v10, %v1914_v56 }
 0x296   : > { %2295 = vmatmul.mubr.bf16.gmra.mrb[28].mxu1 %v4906_v55  ;;  %3029 = vmatmul.mubr.bf16.gmra.mrb[56].mxu0 %v4900_v19 }
 0x297   : > { %3414 = vmatprep.mubr.msk.bf16.mxu1 %vm1921_vm10, %v4950_v13  ;;  %3517 = vmatprep.mubr.msk.bf16.mxu0 %vm1921_vm10, %v4970_v11 }
 0x29b   : > { %v1920_v31 = vpop.permute.xlu1 %1919 }
 0x29c   : > { %v4980_v60 = vsel %vm1921_vm10, %v1808_v36, %v1920_v31  ;;  %v1918_v25 = vpop.permute.xlu0 %1917 }
 0x29d   : > { %v4986_v41 = vsel %vm1921_vm10, %v1807_v32, %v1918_v25 }
 0x29e   : > { %2303 = vmatmul.mubr.bf16.gmra.mrb[32].mxu1 %v4900_v19  ;;  %3037 = vmatmul.mubr.bf16.gmra.mrb[60].mxu0 %v4926_v44 }
 0x29f   : > { %3415 = vmatprep.mubr.msk.bf16.mxu1 %vm1921_vm10, %v4970_v11  ;;  %3518 = vmatprep.mubr.msk.bf16.mxu0 %vm1921_vm10, %v4990_v7 }
 0x2a6   : > { %2311 = vmatmul.mubr.bf16.gmra.mrb[36].mxu1 %v4926_v44  ;;  %3045 = vmatmul.mubr.bf16.gmra.mrb[64].mxu0 %v4920_v2 }
 0x2a7   : > { %3416 = vmatprep.mubr.msk.bf16.mxu1 %vm1921_vm10, %v4990_v7  ;;  %3519 = vmatprep.mubr.msk.bf16.mxu0 %vm1921_vm10, %v4998_v14 }
 0x2ae   : > { %2319 = vmatmul.mubr.bf16.gmra.mrb[40].mxu1 %v4920_v2  ;;  %3053 = vmatmul.mubr.bf16.gmra.mrb[68].mxu0 %v4946_v37 }
 0x2af   : > { %3417 = vmatprep.mubr.msk.bf16.mxu1 %vm1921_vm10, %v4998_v14  ;;  %3520 = vmatprep.mubr.msk.bf16.mxu0 %vm1921_vm10, %v5006_v1 }
 0x2b6   : > { %2327 = vmatmul.mubr.bf16.gmra.mrb[44].mxu1 %v4946_v37  ;;  %3061 = vmatmul.mubr.bf16.gmra.mrb[72].mxu0 %v4940_v50 }
 0x2b7   : > { %3418 = vmatprep.mubr.msk.bf16.mxu1 %vm1921_vm10, %v5006_v1  ;;  %3521 = vmatprep.mubr.msk.bf16.mxu0 %vm1921_vm10, %v5014_v4 }
 0x2be   : > { %2335 = vmatmul.mubr.bf16.gmra.mrb[48].mxu1 %v4940_v50  ;;  %3069 = vmatmul.mubr.bf16.gmra.mrb[76].mxu0 %v4966_v15 }
 0x2bf   : > { %3419 = vmatprep.mubr.msk.bf16.mxu1 %vm1921_vm10, %v5014_v4  ;;  %3522 = vmatprep.mubr.msk.bf16.mxu0 %vm1921_vm10, %v5022_v29 }
 0x2c6   : > { %2343 = vmatmul.mubr.bf16.gmra.mrb[52].mxu1 %v4966_v15  ;;  %3077 = vmatmul.mubr.bf16.gmra.mrb[80].mxu0 %v4960_v30 }
 0x2c7   : > { %3420 = vmatprep.mubr.msk.bf16.mxu1 %vm1921_vm10, %v5022_v29  ;;  %3523 = vmatprep.mubr.msk.bf16.mxu0 %vm1921_vm10, %v5030_v3 }
 0x2ce   : > { %2351 = vmatmul.mubr.bf16.gmra.mrb[56].mxu1 %v4960_v30  ;;  %3085 = vmatmul.mubr.bf16.gmra.mrb[84].mxu0 %v4986_v41 }
 0x2cf   : > { %3421 = vmatprep.mubr.msk.bf16.mxu1 %vm1921_vm10, %v5030_v3  ;;  %3524 = vmatprep.mubr.msk.bf16.mxu0 %vm1921_vm10, %v5038_v35 }
 0x2d6   : > { %2359 = vmatmul.mubr.bf16.gmra.mrb[60].mxu1 %v4986_v41  ;;  %3093 = vmatmul.mubr.bf16.gmra.mrb[88].mxu0 %v4980_v60 }
 0x2d7   : > { %3458 = vmatprep.mubr.msk.bf16.mxu1 %vm1921_vm10, %v4702_v63 }
 0x2de   : > { %2610 = vmatmul.mubr.bf16.vlgmr.msra.gmra.mrb[0].mxu1 %v4846_v47  ;;  %v2802_v47 = vld [vmem:[#allocation3 + $0x118] sm:$0xff] }
 0x2df   : > { %3695 = vmatpush1.bf16.msra.mxu1 %v4565_v17  ;;  %3459 = vmatprep.mubr.msk.bf16.mxu1 %vm1921_vm10, %v4695_v39 }
 0x2e0   : > { %3684 = vmatprep.subr.bf16.mxu1 %v4601_v26 }
 0x2e3   : > { %3696 = vmatpush1.bf16.msra.mxu1 %v4571_v18 }
 0x2e4   : > { %3685 = vmatprep.subr.bf16.mxu1 %v4601_v26 }
 0x2e6   : > { %2618 = vmatmul.mubr.bf16.gmra.mrb[4].mxu1 %v4840_v5 }
 0x2e7   : > { %3460 = vmatprep.mubr.msk.bf16.mxu1 %vm1921_vm10, %v4849_v45  ;;  %3697 = vmatpush1.bf16.msra.mxu1 %v4578_v20 }
 0x2e8   : > { %3686 = vmatprep.subr.bf16.mxu1 %v4601_v26 }
 0x2eb   : > { %3698 = vmatpush1.bf16.msra.mxu1 %v4585_v22 }
 0x2ec   : > { %3687 = vmatprep.subr.bf16.mxu1 %v4601_v26 }
 0x2ee   : > { %2626 = vmatmul.mubr.bf16.gmra.mrb[8].mxu1 %v4866_v34 }
 0x2ef   : > { %3461 = vmatprep.mubr.msk.bf16.mxu1 %vm1921_vm10, %v4870_v40  ;;  %3699 = vmatpush1.bf16.msra.mxu1 %v4592_v23 }
 0x2f0   : > { %3688 = vmatprep.subr.bf16.mxu1 %v4601_v26 }
 0x2f3   : > { %3700 = vmatpush1.bf16.msra.mxu1 %v4599_v24 }
 0x2f4   : > { %3689 = vmatprep.subr.bf16.mxu1 %v4601_v26 }
 0x2f6   : > { %2634 = vmatmul.mubr.bf16.gmra.mrb[12].mxu1 %v4860_v16 }
 0x2f7   : > { %3462 = vmatprep.mubr.msk.bf16.mxu1 %vm1921_vm10, %v4890_v43  ;;  %3701 = vmatpush1.bf16.msra.mxu1 %v4608_v27  ;;  %v4020_v43 = vld [vmem:[#allocation3] sm:$0xff] }
 0x2f8   : > { %3690 = vmatprep.subr.bf16.mxu1 %v4601_v26 }
 0x2fb   : > { %3702 = vmatpush1.bf16.msra.mxu1 %v4615_v0 }
 0x2fc   : > { %3691 = vmatprep.subr.bf16.mxu1 %v4601_v26 }
 0x2fe   : > { %2642 = vmatmul.mubr.bf16.gmra.mrb[16].mxu1 %v4886_v57 }
 0x2ff   : > { %3463 = vmatprep.mubr.msk.bf16.mxu1 %vm1921_vm10, %v4910_v48  ;;  %3703 = vmatpush1.bf16.msra.mxu1 %v4622_v21 }
 0x300   : > { %3692 = vmatprep.subr.bf16.mxu1 %v4601_v26 }
 0x303   : > { %3704 = vmatpush1.bf16.msra.mxu1 %v4629_v53 }
 0x304   : > { %3693 = vmatprep.subr.bf16.mxu1 %v4601_v26 }
 0x306   : > { %2650 = vmatmul.mubr.bf16.gmra.mrb[20].mxu1 %v4880_v59 }
 0x307   : > { %3464 = vmatprep.mubr.msk.bf16.mxu1 %vm1921_vm10, %v4930_v6  ;;  %3705 = vmatpush1.bf16.msra.mxu1 %v4637_v52 }
 0x308   : > { %3694 = vmatprep.subr.bf16.mxu1 %v4601_v26 }
 0x30b   : > { %3706 = vmatpush1.bf16.msra.mxu1 %v4644_v28 }
 0x30e   : > { %2658 = vmatmul.mubr.bf16.gmra.mrb[24].mxu1 %v4906_v55 }
 0x30f   : > { %3465 = vmatprep.mubr.msk.bf16.mxu1 %vm1921_vm10, %v4950_v13 }
 0x316   : > { %2666 = vmatmul.mubr.bf16.gmra.mrb[28].mxu1 %v4900_v19 }
 0x317   : > { %3466 = vmatprep.mubr.msk.bf16.mxu1 %vm1921_vm10, %v4970_v11 }
 0x31e   : > { %2674 = vmatmul.mubr.bf16.gmra.mrb[32].mxu1 %v4926_v44 }
 0x31f   : > { %3467 = vmatprep.mubr.msk.bf16.mxu1 %vm1921_vm10, %v4990_v7 }
 0x326   : > { %2682 = vmatmul.mubr.bf16.gmra.mrb[36].mxu1 %v4920_v2 }
 0x327   : > { %3468 = vmatprep.mubr.msk.bf16.mxu1 %vm1921_vm10, %v4998_v14 }
 0x32e   : > { %2690 = vmatmul.mubr.bf16.gmra.mrb[40].mxu1 %v4946_v37 }
 0x32f   : > { %3469 = vmatprep.mubr.msk.bf16.mxu1 %vm1921_vm10, %v5006_v1 }
 0x336   : > { %2698 = vmatmul.mubr.bf16.gmra.mrb[44].mxu1 %v4940_v50 }
 0x337   : > { %3470 = vmatprep.mubr.msk.bf16.mxu1 %vm1921_vm10, %v5014_v4 }
 0x338   : > { %v5107_v17 = vpop.f32.mrb[32].mxu0 }
 0x339   : > { %v2984_v18 = vpop.f32.mrb[33].mxu0 }
 0x33a   : > { %v5109_v20 = vpop.f32.mrb[34].mxu0 }
 0x33b   : > { %v2987_v22 = vpop.f32.mrb[35].mxu0 }
 0x33e   : > { %2706 = vmatmul.mubr.bf16.gmra.mrb[48].mxu1 %v4966_v15 }
 0x33f   : > { %3471 = vmatprep.mubr.msk.bf16.mxu1 %vm1921_vm10, %v5022_v29 }
 0x341   : > { %v5114_v23 = vpop.f32.mrb[36].mxu0 }
 0x342   : > { %v2992_v24 = vpop.f32.mrb[37].mxu0 }
 0x343   : > { %v5116_v26 = vpop.f32.mrb[38].mxu0 }
 0x344   : > { %v2995_v27 = vpop.f32.mrb[39].mxu0 }
 0x346   : > { %2714 = vmatmul.mubr.bf16.gmra.mrb[52].mxu1 %v4960_v30 }
 0x347   : > { %3472 = vmatprep.mubr.msk.bf16.mxu1 %vm1921_vm10, %v5030_v3  ;;  %v5181_v3 = vld [vmem:[%s5296_s4] ss:$0 sm:$0xff] }
 0x349   : > { %v5121_v0 = vpop.f32.mrb[40].mxu0 }
 0x34a   : > { %v3000_v21 = vpop.f32.mrb[41].mxu0 }
 0x34b   : > { %v5123_v53 = vpop.f32.mrb[42].mxu0 }
 0x34c   : > { %v3003_v52 = vpop.f32.mrb[43].mxu0 }
 0x34e   : > { %2722 = vmatmul.mubr.bf16.gmra.mrb[56].mxu1 %v4986_v41 }
 0x34f   : > { %3473 = vmatprep.mubr.msk.bf16.mxu1 %vm1921_vm10, %v5038_v35 }
 0x351   : > { %v5128_v28 = vpop.f32.mrb[44].mxu0 }
 0x352   : > { %v3008_v39 = vpop.f32.mrb[45].mxu0 }
 0x353   : > { %v5130_v63 = vpop.f32.mrb[46].mxu0 }
 0x354   : > { %v3011_v5 = vpop.f32.mrb[47].mxu0 }
 0x356   : > { %2730 = vmatmul.mubr.bf16.gmra.mrb[60].mxu1 %v4980_v60 }
 0x357   : > { %3525 = vmatprep.mubr.msk.bf16.mxu1 %vm1921_vm10, %v2802_v47 }
 0x359   : > { %v5134_v45 = vpop.f32.mrb[48].mxu0 }
 0x35a   : > { %v3016_v16 = vpop.f32.mrb[49].mxu0 }
 0x35b   : > { %v5136_v34 = vpop.f32.mrb[50].mxu0 }
 0x35c   : > { %v3019_v40 = vpop.f32.mrb[51].mxu0 }
 0x361   : > { %v5138_v59 = vpop.f32.mrb[52].mxu0 }
 0x362   : > { %v3024_v57 = vpop.f32.mrb[53].mxu0  ;;  %3101 = vmatmul.mubr.bf16.vlgmr.msra.gmra.mrb[60].mxu1 %v4020_v43 }
 0x363   : > { %v5140_v33 = vpop.f32.mrb[54].mxu0 }
 0x364   : > { %v3027_v19 = vpop.f32.mrb[55].mxu0 }
 0x369   : > { %v5142_v54 = vpop.f32.mrb[56].mxu0 }
 0x36a   : > { %v3032_v8 = vpop.f32.mrb[57].mxu0 }
 0x36b   : > { %v5144_v55 = vpop.f32.mrb[58].mxu0 }
 0x36c   : > { %v3035_v48 = vpop.f32.mrb[59].mxu0 }
 0x371   : > { %v5146_v49 = vpop.f32.mrb[60].mxu0 }
 0x372   : > { %v3040_v12 = vpop.f32.mrb[61].mxu0 }
 0x373   : > { %v5148_v2 = vpop.f32.mrb[62].mxu0 }
 0x374   : > { %v3043_v61 = vpop.f32.mrb[63].mxu0 }
 0x379   : > { %v5150_v38 = vpop.f32.mrb[64].mxu0 }
 0x37a   : > { %v3048_v44 = vpop.f32.mrb[65].mxu0 }
 0x37b   : > { %v5152_v6 = vpop.f32.mrb[66].mxu0 }
 0x37c   : > { %v3051_v46 = vpop.f32.mrb[67].mxu0 }
 0x381   : > { %v5154_v58 = vpop.f32.mrb[68].mxu0 }
 0x382   : > { %v3056_v50 = vpop.f32.mrb[69].mxu0 }
 0x383   : > { %v5156_v9 = vpop.f32.mrb[70].mxu0 }
 0x384   : > { %v3059_v42 = vpop.f32.mrb[71].mxu0 }
 0x389   : > { %v5158_v37 = vpop.f32.mrb[72].mxu0 }
 0x38a   : > { %v3064_v13 = vpop.f32.mrb[73].mxu0 }
 0x38b   : > { %v5160_v62 = vpop.f32.mrb[74].mxu0 }
 0x38c   : > { %v3067_v51 = vpop.f32.mrb[75].mxu0 }
 0x391   : > { %v5162_v30 = vpop.f32.mrb[76].mxu0 }
 0x392   : > { %v3072_v56 = vpop.f32.mrb[77].mxu0 }
 0x393   : > { %v5164_v10 = vpop.f32.mrb[78].mxu0 }
 0x394   : > { %v3075_v15 = vpop.f32.mrb[79].mxu0 }
 0x399   : > { %v5166_v11 = vpop.f32.mrb[80].mxu0 }
 0x39a   : > { %v3080_v31 = vpop.f32.mrb[81].mxu0 }
 0x39b   : > { %v5168_v36 = vpop.f32.mrb[82].mxu0 }
 0x39c   : > { %v3083_v60 = vpop.f32.mrb[83].mxu0 }
 0x3a1   : > { %v5170_v25 = vpop.f32.mrb[84].mxu0 }
 0x3a2   : > { %v3088_v32 = vpop.f32.mrb[85].mxu0 }
 0x3a3   : > { %v5172_v41 = vpop.f32.mrb[86].mxu0 }
 0x3a4   : > { %v3091_v7 = vpop.f32.mrb[87].mxu0 }
 0x3a9   : > { %v5174_v14 = vpop.f32.mrb[88].mxu0 }
 0x3aa   : > { %v3096_v1 = vpop.f32.mrb[89].mxu0 }
 0x3ab   : > { %v5176_v4 = vpop.f32.mrb[90].mxu0 }
 0x3ac   : > { %v3099_v29 = vpop.f32.mrb[91].mxu0 }
 0x3b1   : > { %v2611_v35 = vpop.f32.mrb[0].mxu1 }
 0x3b2   : > { %v3739_v18 = vadd.f32 %v5181_v3, %v2611_v35  ;;  %v2613_v22 = vpop.f32.mrb[1].mxu1 }
 0x3b3   : > { %v2614_v24 = vpop.f32.mrb[2].mxu1 }
 0x3b4   : > { %v3740_v27 = vadd.f32 %v3739_v18, %v5107_v17  ;;  %v3741_v21 = vadd.f32 %v5181_v3, %v2614_v24  ;;  %v2616_v52 = vpop.f32.mrb[3].mxu1 }
 0x3b6   : > { %v3141_v39 = vmax.f32 %v3740_v27, 0.0  ;;  %v3742_v5 = vadd.f32 %v3741_v21, %v5109_v20 }
 0x3b8   : > { %3173 = vst [vmem:[%s5190_s30] sm:$0xff] %v3141_v39  ;;  %v3142_v47 = vmax.f32 %v3742_v5, 0.0 }
 0x3b9   : > { %v2619_v16 = vpop.f32.mrb[4].mxu1 }
 0x3ba   : > { %3174 = vst [vmem:[%s5190_s30 + $0x8] sm:$0xff] %v3142_v47  ;;  %v3743_v17 = vadd.f32 %v5181_v3, %v2619_v16  ;;  %v2621_v40 = vpop.f32.mrb[5].mxu1 }
 0x3bb   : > { %v2622_v57 = vpop.f32.mrb[6].mxu1 }
 0x3bc   : > { %v3744_v43 = vadd.f32 %v3743_v17, %v5114_v23  ;;  %v3745_v19 = vadd.f32 %v5181_v3, %v2622_v57  ;;  %v2624_v8 = vpop.f32.mrb[7].mxu1 }
 0x3be   : > { %v3143_v48 = vmax.f32 %v3744_v43, 0.0  ;;  %v3746_v12 = vadd.f32 %v3745_v19, %v5116_v26 }
 0x3c0   : > { %3175 = vst [vmem:[%s5190_s30 + $0x10] sm:$0xff] %v3143_v48  ;;  %v3144_v20 = vmax.f32 %v3746_v12, 0.0 }
 0x3c1   : > { %v2627_v61 = vpop.f32.mrb[8].mxu1 }
 0x3c2   : > { %3176 = vst [vmem:[%s5190_s30 + $0x18] sm:$0xff] %v3144_v20  ;;  %v3747_v44 = vadd.f32 %v5181_v3, %v2627_v61  ;;  %v2629_v46 = vpop.f32.mrb[9].mxu1 }
 0x3c3   : > { %v2630_v50 = vpop.f32.mrb[10].mxu1 }
 0x3c4   : > { %v3748_v42 = vadd.f32 %v3747_v44, %v5121_v0  ;;  %v3749_v23 = vadd.f32 %v5181_v3, %v2630_v50  ;;  %v2632_v13 = vpop.f32.mrb[11].mxu1 }
 0x3c6   : > { %v3145_v51 = vmax.f32 %v3748_v42, 0.0  ;;  %v3750_v56 = vadd.f32 %v3749_v23, %v5123_v53 }
 0x3c8   : > { %3177 = vst [vmem:[%s5190_s30 + $0x20] sm:$0xff] %v3145_v51  ;;  %v3146_v26 = vmax.f32 %v3750_v56, 0.0 }
 0x3c9   : > { %v2635_v15 = vpop.f32.mrb[12].mxu1 }
 0x3ca   : > { %3178 = vst [vmem:[%s5190_s30 + $0x28] sm:$0xff] %v3146_v26  ;;  %v3751_v31 = vadd.f32 %v5181_v3, %v2635_v15  ;;  %v2637_v60 = vpop.f32.mrb[13].mxu1 }
 0x3cb   : > { %v2638_v32 = vpop.f32.mrb[14].mxu1 }
 0x3cc   : > { %v3752_v7 = vadd.f32 %v3751_v31, %v5128_v28  ;;  %v3753_v0 = vadd.f32 %v5181_v3, %v2638_v32  ;;  %v2640_v1 = vpop.f32.mrb[15].mxu1 }
 0x3ce   : > { %v3147_v29 = vmax.f32 %v3752_v7, 0.0  ;;  %v3754_v35 = vadd.f32 %v3753_v0, %v5130_v63 }
 0x3d0   : > { %3179 = vst [vmem:[%s5190_s30 + $0x30] sm:$0xff] %v3147_v29  ;;  %v3148_v53 = vmax.f32 %v3754_v35, 0.0 }
 0x3d1   : > { %v2643_v18 = vpop.f32.mrb[16].mxu1 }
 0x3d2   : > { %3180 = vst [vmem:[%s5190_s30 + $0x38] sm:$0xff] %v3148_v53  ;;  %v3755_v22 = vadd.f32 %v5181_v3, %v2643_v18  ;;  %v2645_v24 = vpop.f32.mrb[17].mxu1 }
 0x3d3   : > { %v2646_v27 = vpop.f32.mrb[18].mxu1 }
 0x3d4   : > { %v3756_v21 = vadd.f32 %v3755_v22, %v5134_v45  ;;  %v3757_v28 = vadd.f32 %v5181_v3, %v2646_v27  ;;  %v2648_v52 = vpop.f32.mrb[19].mxu1 }
 0x3d6   : > { %v3149_v39 = vmax.f32 %v3756_v21, 0.0  ;;  %v3758_v5 = vadd.f32 %v3757_v28, %v5136_v34 }
 0x3d8   : > { %3181 = vst [vmem:[%s5190_s30 + $0x40] sm:$0xff] %v3149_v39  ;;  %v3150_v63 = vmax.f32 %v3758_v5, 0.0 }
 0x3d9   : > { %v2651_v47 = vpop.f32.mrb[20].mxu1 }
 0x3da   : > { %3182 = vst [vmem:[%s5190_s30 + $0x48] sm:$0xff] %v3150_v63  ;;  %v3759_v16 = vadd.f32 %v5181_v3, %v2651_v47  ;;  %v2653_v17 = vpop.f32.mrb[21].mxu1 }
 0x3db   : > { %v2654_v40 = vpop.f32.mrb[22].mxu1 }
 0x3dc   : > { %v3760_v57 = vadd.f32 %v3759_v16, %v5138_v59  ;;  %v3761_v45 = vadd.f32 %v5181_v3, %v2654_v40  ;;  %v2656_v43 = vpop.f32.mrb[23].mxu1 }
 0x3de   : > { %v3151_v19 = vmax.f32 %v3760_v57, 0.0  ;;  %v3762_v8 = vadd.f32 %v3761_v45, %v5140_v33 }
 0x3e0   : > { %3183 = vst [vmem:[%s5190_s30 + $0x50] sm:$0xff] %v3151_v19  ;;  %v3152_v34 = vmax.f32 %v3762_v8, 0.0 }
 0x3e1   : > { %v2659_v48 = vpop.f32.mrb[24].mxu1 }
 0x3e2   : > { %3184 = vst [vmem:[%s5190_s30 + $0x58] sm:$0xff] %v3152_v34  ;;  %v3763_v12 = vadd.f32 %v5181_v3, %v2659_v48  ;;  %v2661_v20 = vpop.f32.mrb[25].mxu1 }
 0x3e3   : > { %v2662_v61 = vpop.f32.mrb[26].mxu1 }
 0x3e4   : > { %v3764_v44 = vadd.f32 %v3763_v12, %v5142_v54  ;;  %v3765_v59 = vadd.f32 %v5181_v3, %v2662_v61  ;;  %v2664_v46 = vpop.f32.mrb[27].mxu1 }
 0x3e6   : > { %v3153_v50 = vmax.f32 %v3764_v44, 0.0  ;;  %v3766_v42 = vadd.f32 %v3765_v59, %v5144_v55 }
 0x3e8   : > { %3185 = vst [vmem:[%s5190_s30 + $0x60] sm:$0xff] %v3153_v50  ;;  %v3154_v33 = vmax.f32 %v3766_v42, 0.0 }
 0x3e9   : > { %v2667_v23 = vpop.f32.mrb[28].mxu1 }
 0x3ea   : > { %3186 = vst [vmem:[%s5190_s30 + $0x68] sm:$0xff] %v3154_v33  ;;  %v3767_v13 = vadd.f32 %v5181_v3, %v2667_v23  ;;  %v2669_v51 = vpop.f32.mrb[29].mxu1 }
 0x3eb   : > { %v2670_v56 = vpop.f32.mrb[30].mxu1 }
 0x3ec   : > { %v3768_v26 = vadd.f32 %v3767_v13, %v5146_v49  ;;  %v3769_v54 = vadd.f32 %v5181_v3, %v2670_v56  ;;  %v2672_v15 = vpop.f32.mrb[31].mxu1 }
 0x3ee   : > { %v3155_v31 = vmax.f32 %v3768_v26, 0.0  ;;  %v3770_v60 = vadd.f32 %v3769_v54, %v5148_v2 }
 0x3f0   : > { %3187 = vst [vmem:[%s5190_s30 + $0x70] sm:$0xff] %v3155_v31  ;;  %v3156_v55 = vmax.f32 %v3770_v60, 0.0 }
 0x3f1   : > { %v2675_v32 = vpop.f32.mrb[32].mxu1 }
 0x3f2   : > { %3188 = vst [vmem:[%s5190_s30 + $0x78] sm:$0xff] %v3156_v55  ;;  %v3771_v7 = vadd.f32 %v5181_v3, %v2675_v32  ;;  %v2677_v0 = vpop.f32.mrb[33].mxu1 }
 0x3f3   : > { %v2678_v1 = vpop.f32.mrb[34].mxu1 }
 0x3f4   : > { %v3772_v29 = vadd.f32 %v3771_v7, %v5150_v38  ;;  %v3773_v49 = vadd.f32 %v5181_v3, %v2678_v1  ;;  %v2680_v35 = vpop.f32.mrb[35].mxu1 }
 0x3f6   : > { %v3157_v53 = vmax.f32 %v3772_v29, 0.0  ;;  %v3774_v18 = vadd.f32 %v3773_v49, %v5152_v6 }
 0x3f8   : > { %3189 = vst [vmem:[%s5190_s30 + $0x80] sm:$0xff] %v3157_v53  ;;  %v3158_v2 = vmax.f32 %v3774_v18, 0.0 }
 0x3f9   : > { %v2683_v22 = vpop.f32.mrb[36].mxu1 }
 0x3fa   : > { %3190 = vst [vmem:[%s5190_s30 + $0x88] sm:$0xff] %v3158_v2  ;;  %v3775_v24 = vadd.f32 %v5181_v3, %v2683_v22  ;;  %v2685_v27 = vpop.f32.mrb[37].mxu1 }
 0x3fb   : > { %v2686_v21 = vpop.f32.mrb[38].mxu1 }
 0x3fc   : > { %v3776_v28 = vadd.f32 %v3775_v24, %v5154_v58  ;;  %v3777_v38 = vadd.f32 %v5181_v3, %v2686_v21  ;;  %v2688_v52 = vpop.f32.mrb[39].mxu1 }
 0x3fe   : > { %v3159_v39 = vmax.f32 %v3776_v28, 0.0  ;;  %v3778_v5 = vadd.f32 %v3777_v38, %v5156_v9 }
 0x400   : > { %3191 = vst [vmem:[%s5190_s30 + $0x90] sm:$0xff] %v3159_v39  ;;  %v3160_v6 = vmax.f32 %v3778_v5, 0.0 }
 0x401   : > { %v2691_v63 = vpop.f32.mrb[40].mxu1 }
 0x402   : > { %3192 = vst [vmem:[%s5190_s30 + $0x98] sm:$0xff] %v3160_v6  ;;  %v3779_v47 = vadd.f32 %v5181_v3, %v2691_v63  ;;  %v2693_v16 = vpop.f32.mrb[41].mxu1 }
 0x403   : > { %v2694_v17 = vpop.f32.mrb[42].mxu1 }
 0x404   : > { %v3780_v40 = vadd.f32 %v3779_v47, %v5158_v37  ;;  %v3781_v58 = vadd.f32 %v5181_v3, %v2694_v17  ;;  %v2696_v57 = vpop.f32.mrb[43].mxu1 }
 0x406   : > { %v3161_v45 = vmax.f32 %v3780_v40, 0.0  ;;  %v3782_v43 = vadd.f32 %v3781_v58, %v5160_v62 }
 0x408   : > { %3193 = vst [vmem:[%s5190_s30 + $0xa0] sm:$0xff] %v3161_v45  ;;  %v3162_v9 = vmax.f32 %v3782_v43, 0.0 }
 0x409   : > { %v2699_v19 = vpop.f32.mrb[44].mxu1 }
 0x40a   : > { %3194 = vst [vmem:[%s5190_s30 + $0xa8] sm:$0xff] %v3162_v9  ;;  %v3783_v8 = vadd.f32 %v5181_v3, %v2699_v19  ;;  %v2701_v34 = vpop.f32.mrb[45].mxu1 }
 0x40b   : > { %v2702_v48 = vpop.f32.mrb[46].mxu1 }
 0x40c   : > { %v3784_v12 = vadd.f32 %v3783_v8, %v5162_v30  ;;  %v3785_v37 = vadd.f32 %v5181_v3, %v2702_v48  ;;  %v2704_v20 = vpop.f32.mrb[47].mxu1 }
 0x40e   : > { %v3163_v61 = vmax.f32 %v3784_v12, 0.0  ;;  %v3786_v44 = vadd.f32 %v3785_v37, %v5164_v10 }
 0x410   : > { %3195 = vst [vmem:[%s5190_s30 + $0xb0] sm:$0xff] %v3163_v61  ;;  %v3164_v62 = vmax.f32 %v3786_v44, 0.0 }
 0x411   : > { %v2707_v59 = vpop.f32.mrb[48].mxu1 }
 0x412   : > { %3196 = vst [vmem:[%s5190_s30 + $0xb8] sm:$0xff] %v3164_v62  ;;  %v3787_v46 = vadd.f32 %v5181_v3, %v2707_v59  ;;  %v2709_v50 = vpop.f32.mrb[49].mxu1 }
 0x413   : > { %v2710_v42 = vpop.f32.mrb[50].mxu1 }
 0x414   : > { %v3788_v33 = vadd.f32 %v3787_v46, %v5166_v11  ;;  %v3789_v30 = vadd.f32 %v5181_v3, %v2710_v42  ;;  %v2712_v23 = vpop.f32.mrb[51].mxu1 }
 0x416   : > { %v3165_v13 = vmax.f32 %v3788_v33, 0.0  ;;  %v3790_v51 = vadd.f32 %v3789_v30, %v5168_v36 }
 0x418   : > { %3197 = vst [vmem:[%s5190_s30 + $0xc0] sm:$0xff] %v3165_v13  ;;  %v3166_v10 = vmax.f32 %v3790_v51, 0.0 }
 0x419   : > { %v2715_v56 = vpop.f32.mrb[52].mxu1 }
 0x41a   : > { %3198 = vst [vmem:[%s5190_s30 + $0xc8] sm:$0xff] %v3166_v10  ;;  %v3791_v26 = vadd.f32 %v5181_v3, %v2715_v56  ;;  %v2717_v54 = vpop.f32.mrb[53].mxu1 }
 0x41b   : > { %v2718_v15 = vpop.f32.mrb[54].mxu1 }
 0x41c   : > { %v3792_v31 = vadd.f32 %v3791_v26, %v5170_v25  ;;  %v3793_v11 = vadd.f32 %v5181_v3, %v2718_v15  ;;  %v2720_v60 = vpop.f32.mrb[55].mxu1 }
 0x41e   : > { %v3167_v55 = vmax.f32 %v3792_v31, 0.0  ;;  %v3794_v32 = vadd.f32 %v3793_v11, %v5172_v41 }
 0x420   : > { %3199 = vst [vmem:[%s5190_s30 + $0xd0] sm:$0xff] %v3167_v55  ;;  %v3168_v36 = vmax.f32 %v3794_v32, 0.0 }
 0x421   : > { %v2723_v7 = vpop.f32.mrb[56].mxu1 }
 0x422   : > { %3200 = vst [vmem:[%s5190_s30 + $0xd8] sm:$0xff] %v3168_v36  ;;  %v3795_v0 = vadd.f32 %v5181_v3, %v2723_v7  ;;  %v2725_v1 = vpop.f32.mrb[57].mxu1 }
 0x423   : > { %v2726_v29 = vpop.f32.mrb[58].mxu1 }
 0x424   : > { %v3796_v49 = vadd.f32 %v3795_v0, %v5174_v14  ;;  %v3797_v25 = vadd.f32 %v5181_v3, %v2726_v29  ;;  %v2728_v35 = vpop.f32.mrb[59].mxu1 }
 0x426   : > { %v3169_v53 = vmax.f32 %v3796_v49, 0.0  ;;  %v3798_v18 = vadd.f32 %v3797_v25, %v5176_v4 }
 0x428   : > { %3201 = vst [vmem:[%s5190_s30 + $0xe0] sm:$0xff] %v3169_v53  ;;  %v3170_v41 = vmax.f32 %v3798_v18, 0.0 }
 0x42a   : > { %3202 = vst [vmem:[%s5190_s30 + $0xe8] sm:$0xff] %v3170_v41 }
 0x435   : > { %v3102_v2 = vpop.f32.mrb[60].mxu1 }
 0x436   : > { %v3799_v22 = vadd.f32 %v5181_v3, %v3102_v2  ;;  %v3104_v24 = vpop.f32.mrb[61].mxu1 }
 0x437   : > { %v3105_v27 = vpop.f32.mrb[62].mxu1 }
 0x438   : > { %v3171_v21 = vmax.f32 %v3799_v22, 0.0  ;;  %v3800_v28 = vadd.f32 %v5181_v3, %v3105_v27  ;;  %v3107_v38 = vpop.f32.mrb[63].mxu1 }
 0x43a   : > { %3203 = vst [vmem:[%s5190_s30 + $0xf0] sm:$0xff] %v3171_v21  ;;  %v3172_v14 = vmax.f32 %v3800_v28, 0.0 }
 0x43c   : > { %3204 = vst [vmem:[%s5190_s30 + $0xf8] sm:$0xff] %v3172_v14 }
 0x43d PF: > { %s15_s20 = sadd.s32 1, %s4043_s20   ;;  %s5302_s18 = smov %s4039_s19 }
 0x43e   : > { %p12_p5 = scmp.ge.s32.totalorder %s15_s20, 4   ;;  %s5303_s19 = smov %s5305_s21 }
 0x440   :  { %14 = sbr.rel (!%p12_p5) target bundleno = 2 (0x2), region = 88 }

</bundles_post_ra>
